<compile_context>
chip_gen: v7x
topology: tpu7x:2x2x1
jax: 0.10.0
libtpu: 0.0.40
codegen_flags: <defaults>
</compile_context>

<pallas_src>
import functools

import jax
import jax.numpy as jnp
from jax.experimental import pallas as pl
from jax.experimental.pallas import tpu as pltpu

HIDDEN1 = 1200
HIDDEN2 = 360
_LANE = 128
_SUBLANE = 8


def _round_up(n, m):
    return ((n + m - 1) // m) * m


# --------------------------------------------------------------------------
# Kernel: one batch tile through all three (linear + tanh) layers.
# Weights arrive already cast to mxu_dtype; biases stay f32; accumulation,
# bias add and tanh are f32.
# --------------------------------------------------------------------------
def _mlp_kernel(x_ref, w1_ref, b1_ref, w2_ref, b2_ref, w3_ref, b3_ref, o_ref,
                *, mxu_dtype):
    # Layer 1: (TB, D) @ (D, 1280) -> f32 acc, +bias, tanh
    h = jnp.dot(x_ref[...].astype(mxu_dtype), w1_ref[...],
                preferred_element_type=jnp.float32) + b1_ref[...]
    h = jnp.tanh(h)
    # Layer 2: (TB, 1280) @ (1280, 384)
    h = jnp.dot(h.astype(mxu_dtype), w2_ref[...],
                preferred_element_type=jnp.float32) + b2_ref[...]
    h = jnp.tanh(h)
    # Layer 3: (TB, 384) @ (384, OUT_PAD)
    h = jnp.dot(h.astype(mxu_dtype), w3_ref[...],
                preferred_element_type=jnp.float32) + b3_ref[...]
    o_ref[...] = jnp.tanh(h)


# --------------------------------------------------------------------------
# Parameter handling
# --------------------------------------------------------------------------
def init_params(key, input_dim, output_dim):
    """nn.Linear-style U(-1/sqrt(fan_in), 1/sqrt(fan_in)) init.

    Weights stored as (in_features, out_features) so the kernel computes
    x @ W + b, numerically identical to PyTorch's x @ W_pt^T + b."""
    ks = jax.random.split(key, 6)

    def linear(kw, kb, fan_in, fan_out):
        bound = 1.0 / jnp.sqrt(jnp.float32(fan_in))
        w = jax.random.uniform(kw, (fan_in, fan_out), jnp.float32, -bound, bound)
        b = jax.random.uniform(kb, (fan_out,), jnp.float32, -bound, bound)
        return w, b

    w1, b1 = linear(ks[0], ks[1], input_dim, HIDDEN1)
    w2, b2 = linear(ks[2], ks[3], HIDDEN1, HIDDEN2)
    w3, b3 = linear(ks[4], ks[5], HIDDEN2, output_dim)
    return (w1, b1, w2, b2, w3, b3)


def prepare_params(params, mxu_dtype=jnp.float32):
    """Zero-pad hidden/output dims to lane multiples (128) and cast weights to
    the MXU input dtype.  Padded bias entries are 0 and padded weight rows are
    0, so the padded network computes exactly the same values in the original
    columns.  Call once; reuse across forward calls."""
    w1, b1, w2, b2, w3, b3 = params
    d = w1.shape[0]
    out_dim = w3.shape[1]
    h1p = _round_up(HIDDEN1, _LANE)
    h2p = _round_up(HIDDEN2, _LANE)
    outp = _round_up(out_dim, _LANE)

    def pad2(a, rows, cols):
        a = jnp.reshape(a, (a.shape[0], -1)) if a.ndim == 2 else jnp.reshape(a, (1, -1))
        return jnp.pad(a, ((0, rows - a.shape[0]), (0, cols - a.shape[1])))

    w1p = pad2(w1, d, h1p).astype(mxu_dtype)
    b1p = pad2(b1, 1, h1p).astype(jnp.float32)
    w2p = pad2(w2, h1p, h2p).astype(mxu_dtype)
    b2p = pad2(b2, 1, h2p).astype(jnp.float32)
    w3p = pad2(w3, h2p, outp).astype(mxu_dtype)
    b3p = pad2(b3, 1, outp).astype(jnp.float32)
    return (w1p, b1p, w2p, b2p, w3p, b3p), out_dim


def _vmem_limit_bytes(tb, d, h1p, h2p, outp, w_itemsize):
    """Right-sized VMEM request: resident weights + double-buffered I/O tiles +
    activations, with 1.5x headroom, clamped to [16 MiB, 32 MiB]."""
    weights = (d * h1p + h1p * h2p + h2p * outp) * w_itemsize
    biases = (h1p + h2p + outp) * 4
    io_tiles = 2 * (tb * d * 4 + tb * outp * 4)          # double-buffered x / out
    interm = tb * (h1p + h2p) * 4 + tb * max(h1p, h2p) * w_itemsize
    est = int(1.5 * (weights + biases + io_tiles + interm))
    return max(16 * 1024 * 1024, min(est, 32 * 1024 * 1024))


# --------------------------------------------------------------------------
# Forward
# --------------------------------------------------------------------------
def neural_network_forward(x, padded_params, output_dim, *, batch_tile=256,
                           mxu_dtype=jnp.float32):
    """Equivalent of NerualNetwork.forward: flatten, cast f32, 3x (linear+tanh).

    `padded_params` comes from prepare_params.  Use batch_tile=128 on v5e
    (matches the 4x128^2 MXU geometry); 256 elsewhere."""
    w1, b1, w2, b2, w3, b3 = padded_params
    batch = x.shape[0]
    x2d = jnp.reshape(x, (batch, -1)).astype(jnp.float32)
    d = x2d.shape[1]
    h1p, h2p, outp = w1.shape[1], w2.shape[1], w3.shape[1]
    assert w1.shape[0] == d, (w1.shape, d)

    tb = min(batch_tile, _round_up(batch, _SUBLANE))
    grid = (pl.cdiv(batch, tb),)

    kernel = functools.partial(_mlp_kernel, mxu_dtype=mxu_dtype)

    def resident(shape):  # weights/biases: same block every grid step -> DMA'd once
        return pl.BlockSpec(shape, lambda i: (0, 0))

    out_padded = pl.pallas_call(
        kernel,
        out_shape=jax.ShapeDtypeStruct((batch, outp), jnp.float32),
        grid=grid,
        in_specs=[
            pl.BlockSpec((tb, d), lambda i: (i, 0)),   # x: tiled over batch
            resident((d, h1p)), resident((1, h1p)),
            resident((h1p, h2p)), resident((1, h2p)),
            resident((h2p, outp)), resident((1, outp)),
        ],
        out_specs=pl.BlockSpec((tb, outp), lambda i: (i, 0)),
        compiler_params=pltpu.CompilerParams(
            dimension_semantics=("parallel",),         # v7x: split tiles across TCs
            vmem_limit_bytes=_vmem_limit_bytes(
                tb, d, h1p, h2p, outp, jnp.dtype(mxu_dtype).itemsize),
        ),
    )(x2d, w1, b1, w2, b2, w3, b3)

    return out_padded[:, :output_dim]


# --------------------------------------------------------------------------
# Pure-JAX reference (unpadded, f32) for correctness checks.
# --------------------------------------------------------------------------
def _reference_forward(x, params):
    w1, b1, w2, b2, w3, b3 = params
    h = jnp.reshape(x, (x.shape[0], -1)).astype(jnp.float32)
    h = jnp.tanh(h @ w1 + b1)
    h = jnp.tanh(h @ w2 + b2)
    h = jnp.tanh(h @ w3 + b3)
    return h


if __name__ == "__main__":
    key = jax.random.PRNGKey(0)
    k_x, k_p = jax.random.split(key)

    # Small example: batch=2, input flattens to input_dim=32, output_dim=8.
    batch, output_dim = 2, 8
    x = jax.random.normal(k_x, (batch, 4, 8), dtype=jnp.float32)  # flattens to 32
    input_dim = 4 * 8

    params = init_params(k_p, input_dim, output_dim)
    ref = _reference_forward(x, params)

    # f32 MXU path: exact module semantics.
    padded_f32, out_dim = prepare_params(params, mxu_dtype=jnp.float32)
    out = jax.block_until_ready(neural_network_forward(x, padded_f32, out_dim))
    assert out.shape == (batch, output_dim), out.shape
    assert jnp.allclose(out, ref, atol=1e-5, rtol=1e-5), "f32 path mismatch vs reference"

    # bf16-input / f32-accumulate path (v6e/v7x MXU throughput option).
    padded_bf16, _ = prepare_params(params, mxu_dtype=jnp.bfloat16)
    out_bf16 = jax.block_until_ready(
        neural_network_forward(x, padded_bf16, out_dim, mxu_dtype=jnp.bfloat16))
    assert out_bf16.shape == (batch, output_dim), out_bf16.shape
    assert bool(jnp.max(jnp.abs(out_bf16 - ref)) < 5e-2), "bf16 path out of tolerance"

    print("KERNEL_OK")
</pallas_src>

<mosaic_0001>
module attributes {stable_mosaic.version = 11 : i64} {
  func.func @_mlp_kernel(%arg0: i32, %arg1: memref<8x32xf32, #tpu.memory_space<vmem>>, %arg2: memref<32x1280xf32, #tpu.memory_space<vmem>>, %arg3: memref<1x1280xf32, #tpu.memory_space<vmem>>, %arg4: memref<1280x384xf32, #tpu.memory_space<vmem>>, %arg5: memref<1x384xf32, #tpu.memory_space<vmem>>, %arg6: memref<384x128xf32, #tpu.memory_space<vmem>>, %arg7: memref<1x128xf32, #tpu.memory_space<vmem>>, %arg8: memref<8x128xf32, #tpu.memory_space<vmem>>) attributes {dimension_semantics = [#tpu.dimension_semantics<parallel>], iteration_bounds = array<i64: 1>, scalar_prefetch = 0 : i64, scratch_operands = 0 : i64, tpu.core_type = #tpu.core_type<tc>, window_params = [{transform_indices = @transform_0, window_bounds = array<i64: 8, 32>}, {pipeline_mode = #tpu.pipeline_mode<synchronous>, transform_indices = @transform_1, window_bounds = array<i64: 32, 1280>}, {pipeline_mode = #tpu.pipeline_mode<synchronous>, transform_indices = @transform_2, window_bounds = array<i64: 1, 1280>}, {pipeline_mode = #tpu.pipeline_mode<synchronous>, transform_indices = @transform_3, window_bounds = array<i64: 1280, 384>}, {pipeline_mode = #tpu.pipeline_mode<synchronous>, transform_indices = @transform_4, window_bounds = array<i64: 1, 384>}, {pipeline_mode = #tpu.pipeline_mode<synchronous>, transform_indices = @transform_5, window_bounds = array<i64: 384, 128>}, {pipeline_mode = #tpu.pipeline_mode<synchronous>, transform_indices = @transform_6, window_bounds = array<i64: 1, 128>}, {transform_indices = @transform_7, window_bounds = array<i64: 8, 128>}]} {
    %c0 = arith.constant 0 : index
    %c0_0 = arith.constant 0 : index
    %0 = vector.load %arg1[%c0, %c0_0] : memref<8x32xf32, #tpu.memory_space<vmem>>, vector<8x32xf32>
    %c0_1 = arith.constant 0 : index
    %c0_2 = arith.constant 0 : index
    %1 = vector.load %arg2[%c0_1, %c0_2] : memref<32x1280xf32, #tpu.memory_space<vmem>>, vector<32x1280xf32>
    %cst = arith.constant dense<0.000000e+00> : vector<8x1280xf32>
    %2 = tpu.matmul %0, %1, %cst {dimension_numbers = #tpu.dot_dimension_numbers<[1], [0], [0], [1], [0, 0, 1, 1], [], []>} : vector<8x32xf32>, vector<32x1280xf32>, vector<8x1280xf32> -> vector<8x1280xf32>
    %c0_3 = arith.constant 0 : index
    %c0_4 = arith.constant 0 : index
    %3 = vector.load %arg3[%c0_3, %c0_4] : memref<1x1280xf32, #tpu.memory_space<vmem>>, vector<1x1280xf32>
    %4 = vector.broadcast %3 : vector<1x1280xf32> to vector<8x1280xf32>
    %5 = arith.addf %2, %4 : vector<8x1280xf32>
    %6 = math.tanh %5 : vector<8x1280xf32>
    %c0_5 = arith.constant 0 : index
    %c0_6 = arith.constant 0 : index
    %7 = vector.load %arg4[%c0_5, %c0_6] : memref<1280x384xf32, #tpu.memory_space<vmem>>, vector<1280x384xf32>
    %cst_7 = arith.constant dense<0.000000e+00> : vector<8x384xf32>
    %8 = tpu.matmul %6, %7, %cst_7 {dimension_numbers = #tpu.dot_dimension_numbers<[1], [0], [0], [1], [0, 0, 1, 1], [], []>} : vector<8x1280xf32>, vector<1280x384xf32>, vector<8x384xf32> -> vector<8x384xf32>
    %c0_8 = arith.constant 0 : index
    %c0_9 = arith.constant 0 : index
    %9 = vector.load %arg5[%c0_8, %c0_9] : memref<1x384xf32, #tpu.memory_space<vmem>>, vector<1x384xf32>
    %10 = vector.broadcast %9 : vector<1x384xf32> to vector<8x384xf32>
    %11 = arith.addf %8, %10 : vector<8x384xf32>
    %12 = math.tanh %11 : vector<8x384xf32>
    %c0_10 = arith.constant 0 : index
    %c0_11 = arith.constant 0 : index
    %13 = vector.load %arg6[%c0_10, %c0_11] : memref<384x128xf32, #tpu.memory_space<vmem>>, vector<384x128xf32>
    %cst_12 = arith.constant dense<0.000000e+00> : vector<8x128xf32>
    %14 = tpu.matmul %12, %13, %cst_12 {dimension_numbers = #tpu.dot_dimension_numbers<[1], [0], [0], [1], [0, 0, 1, 1], [], []>} : vector<8x384xf32>, vector<384x128xf32>, vector<8x128xf32> -> vector<8x128xf32>
    %c0_13 = arith.constant 0 : index
    %c0_14 = arith.constant 0 : index
    %15 = vector.load %arg7[%c0_13, %c0_14] : memref<1x128xf32, #tpu.memory_space<vmem>>, vector<1x128xf32>
    %16 = vector.broadcast %15 : vector<1x128xf32> to vector<8x128xf32>
    %17 = arith.addf %14, %16 : vector<8x128xf32>
    %18 = math.tanh %17 : vector<8x128xf32>
    %c0_15 = arith.constant 0 : index
    %c0_16 = arith.constant 0 : index
    %19 = vector.load %arg8[%c0_15, %c0_16] : memref<8x128xf32, #tpu.memory_space<vmem>>, vector<8x128xf32>
    tpu.vector_store %arg8[%c0_15, %c0_16], %18 {strides = array<i32>} : memref<8x128xf32, #tpu.memory_space<vmem>>, vector<8x128xf32>,
    return
  }
  func.func @transform_0(%arg0: i32) -> (i32, i32) {
    %c0_i32 = arith.constant 0 : i32
    %c0_i32_0 = arith.constant 0 : i32
    return %arg0, %c0_i32 : i32, i32
  }
  func.func @transform_1(%arg0: i32) -> (i32, i32) {
    %c0_i32 = arith.constant 0 : i32
    %c0_i32_0 = arith.constant 0 : i32
    %c0_i32_1 = arith.constant 0 : i32
    return %c0_i32, %c0_i32_0 : i32, i32
  }
  func.func @transform_2(%arg0: i32) -> (i32, i32) {
    %c0_i32 = arith.constant 0 : i32
    %c0_i32_0 = arith.constant 0 : i32
    %c0_i32_1 = arith.constant 0 : i32
    return %c0_i32, %c0_i32_0 : i32, i32
  }
  func.func @transform_3(%arg0: i32) -> (i32, i32) {
    %c0_i32 = arith.constant 0 : i32
    %c0_i32_0 = arith.constant 0 : i32
    %c0_i32_1 = arith.constant 0 : i32
    return %c0_i32, %c0_i32_0 : i32, i32
  }
  func.func @transform_4(%arg0: i32) -> (i32, i32) {
    %c0_i32 = arith.constant 0 : i32
    %c0_i32_0 = arith.constant 0 : i32
    %c0_i32_1 = arith.constant 0 : i32
    return %c0_i32, %c0_i32_0 : i32, i32
  }
  func.func @transform_5(%arg0: i32) -> (i32, i32) {
    %c0_i32 = arith.constant 0 : i32
    %c0_i32_0 = arith.constant 0 : i32
    %c0_i32_1 = arith.constant 0 : i32
    return %c0_i32, %c0_i32_0 : i32, i32
  }
  func.func @transform_6(%arg0: i32) -> (i32, i32) {
    %c0_i32 = arith.constant 0 : i32
    %c0_i32_0 = arith.constant 0 : i32
    %c0_i32_1 = arith.constant 0 : i32
    return %c0_i32, %c0_i32_0 : i32, i32
  }
  func.func @transform_7(%arg0: i32) -> (i32, i32) {
    %c0_i32 = arith.constant 0 : i32
    %c0_i32_0 = arith.constant 0 : i32
    return %arg0, %c0_i32 : i32, i32
  }
}

</mosaic_0001>

<bundles_post_ra>
// kernel: tpu_custom_call.1
= control target key start
LH: loop header
LB: loop body
LE: loop exit
PB: predicated region body
PF: predicated region fallthrough
CT: control target
= control target key end

     0   :  { %12 = vsyncpa [#allocation3], 0  ;;  %s3363_s0 = inlined_call_operand.hbm [shape: f32[2,32], index: 0, kind: input, shape index: {}]   ;;  %s3364_s1 = inlined_call_operand.hbm [shape: f32[32,1280], index: 1, kind: input, shape index: {}]   ;;  %s3365_s2 = inlined_call_operand.hbm [shape: f32[1,1280], index: 2, kind: input, shape index: {}]   ;;  %s3366_s3 = inlined_call_operand.hbm [shape: f32[1280,384], index: 3, kind: input, shape index: {}]   ;;  %s3367_s4 = inlined_call_operand.hbm [shape: f32[1,384], index: 4, kind: input, shape index: {}]   ;;  %s3368_s5 = inlined_call_operand.hbm [shape: f32[384,128], index: 5, kind: input, shape index: {}]   ;;  %s3369_s6 = inlined_call_operand.hbm [shape: f32[1,128], index: 6, kind: input, shape index: {}]   ;;  %s3370_s7 = inlined_call_operand.hbm [shape: f32[2,128], index: 7, kind: output, shape index: {}]  }
   0x1   :  { %13 = vsyncpa [#allocation6], 0 }
   0x2   :  { %14 = vsyncpa [#allocation9], 0 }
   0x3   :  { %15 = vsyncpa [#allocation12], 0 }
   0x4   :  { %16 = vsyncpa [#allocation4], 0 }
   0x5   :  { %21 = vsyncadd [#allocation3], 96  ;;  %s3089_s24 = smov [#allocation5]   ;;  %s2903_s28 = scalar_lea.hbm %s3364_s1, 5120 }
   0x6   :  { %s34_s25 = sshll.u32 %s3089_s24, 4  ;;  %p2904_p0 = scmp.ne.s32.totalorder %s3364_s1, %s2903_s28  ;;  %s35_s25 = int_to_ptr.vmem [resolvable:$true] %s34_s25 }
   0x7   :  { %p2907_p1 = scmp.lt.u32.totalorder %s2903_s28, %s3364_s1 }
   0x9   :  { %p2909_p2 = pnand %p2907_p1, %p2904_p0 }
   0xb   :  { %2912 = shalt.err (!%p2909_p2)
}
   0xc   :  { %s2913_s10 = scalar_lea.vmem %s35_s25, 5120  ;;  %p2918_p4 = scmp.lt.s32.totalorder %s35_s25, %s35_s25 }
   0xd   :  { %p2914_p3 = scmp.ne.s32.totalorder %s35_s25, %s2913_s10  ;;  %p2919_p5 = scmp.lt.s32.totalorder %s2913_s10, %s2913_s10 }
   0xf   :  { %p2920_p6 = por %p2919_p5, %p2918_p4 }
  0x11   :  { %p2921_p7 = pnand %p2920_p6, %p2914_p3 }
  0x13   :  { %2924 = shalt.err (!%p2921_p7)
}
  0x14   :  { %s3090_s11 = smov 1280   ;;  %s3091_s12 = smov 80  }
  0x15   :  { %40 = dma.hbm_to_vmem [thread:$0]  %s3364_s1, 5120, %s35_s25, [#allocation6], %s3090_s11, %s3090_s11, %s3091_s12  }
  0x16   :  { %s3092_s15 = smov [#allocation8]   ;;  %s2925_s19 = scalar_lea.hbm %s3366_s3, 61440 }
  0x17   :  { %s56_s16 = sshll.u32 %s3092_s15, 4  ;;  %p2926_p8 = scmp.ne.s32.totalorder %s3366_s3, %s2925_s19  ;;  %s57_s16 = int_to_ptr.vmem [resolvable:$true] %s56_s16 }
  0x18   :  { %p2929_p9 = scmp.lt.u32.totalorder %s2925_s19, %s3366_s3 }
  0x1a   :  { %p2931_p10 = pnand %p2929_p9, %p2926_p8 }
  0x1c   :  { %2934 = shalt.err (!%p2931_p10)
}
  0x1d   :  { %s2935_s24 = scalar_lea.vmem %s57_s16, 61440  ;;  %p2940_p12 = scmp.lt.s32.totalorder %s57_s16, %s57_s16 }
  0x1e   :  { %p2936_p11 = scmp.ne.s32.totalorder %s57_s16, %s2935_s24  ;;  %p2941_p13 = scmp.lt.s32.totalorder %s2935_s24, %s2935_s24 }
  0x20   :  { %p2942_p0 = por %p2941_p13, %p2940_p12 }
  0x22   :  { %p2943_p1 = pnand %p2942_p0, %p2936_p11 }
  0x24   :  { %2946 = shalt.err (!%p2943_p1)
}
  0x25   :  { %s3093_s1 = smov 384   ;;  %s3094_s25 = smov 24  }
  0x26   :  { %62 = dma.hbm_to_vmem [thread:$0]  %s3366_s3, 61440, %s57_s16, [#allocation9], %s3093_s1, %s3093_s1, %s3094_s25  }
  0x27   :  { %s3095_s28 = smov [#allocation11]   ;;  %s2947_s9 = scalar_lea.hbm %s3368_s5, 6144 }
  0x28   :  { %s78_s29 = sshll.u32 %s3095_s28, 4  ;;  %p2948_p2 = scmp.ne.s32.totalorder %s3368_s5, %s2947_s9  ;;  %s79_s29 = int_to_ptr.vmem [resolvable:$true] %s78_s29 }
  0x29   :  { %p2951_p3 = scmp.lt.u32.totalorder %s2947_s9, %s3368_s5 }
  0x2b   :  { %p2953_p4 = pnand %p2951_p3, %p2948_p2 }
  0x2d   :  { %2956 = shalt.err (!%p2953_p4)
}
  0x2e   :  { %s2957_s14 = scalar_lea.vmem %s79_s29, 6144  ;;  %p2962_p6 = scmp.lt.s32.totalorder %s79_s29, %s79_s29 }
  0x2f   :  { %p2958_p5 = scmp.ne.s32.totalorder %s79_s29, %s2957_s14  ;;  %p2963_p7 = scmp.lt.s32.totalorder %s2957_s14, %s2957_s14 }
  0x31   :  { %p2964_p8 = por %p2963_p7, %p2962_p6 }
  0x33   :  { %p2965_p9 = pnand %p2964_p8, %p2958_p5 }
  0x35   :  { %2968 = shalt.err (!%p2965_p9)
}
  0x36   :  { %s3096_s3 = smov 128   ;;  %s3097_s15 = smov 8  }
  0x37   :  { %84 = dma.hbm_to_vmem [thread:$0]  %s3368_s5, 6144, %s79_s29, [#allocation12], %s3096_s3, %s3096_s3, %s3097_s15  }
  0x38   :  { %s3098_s18 = smov [#allocation2]   ;;  %s2969_s22 = scalar_lea.hbm %s3363_s0, 32 }
  0x39   :  { %s22_s19 = sshll.u32 %s3098_s18, 4  ;;  %p2970_p10 = scmp.ne.s32.totalorder %s3363_s0, %s2969_s22  ;;  %s23_s19 = int_to_ptr.vmem [resolvable:$true] %s22_s19 }
  0x3a   :  { %p2973_p11 = scmp.lt.u32.totalorder %s2969_s22, %s3363_s0 }
  0x3c   :  { %p2975_p12 = pnand %p2973_p11, %p2970_p10 }
  0x3e   :  { %2978 = shalt.err (!%p2975_p12)
}
  0x3f   :  { %s2979_s26 = scalar_lea.vmem %s23_s19, 32  ;;  %s2983_s5 = scalar_lea.vmem %s23_s19, 128 }
  0x40   :  { %p2980_p13 = scmp.ne.s32.totalorder %s23_s19, %s2979_s26  ;;  %p2984_p0 = scmp.lt.s32.totalorder %s23_s19, %s23_s19 }
  0x41   :  { %p2985_p1 = scmp.lt.s32.totalorder %s2983_s5, %s2979_s26 }
  0x43   :  { %p2986_p2 = por %p2985_p1, %p2984_p0 }
  0x45   :  { %p2987_p3 = pnand %p2986_p2, %p2980_p13 }
  0x47   :  { %2990 = shalt.err (!%p2987_p3)
}
  0x48   :  { %s3099_s27 = smov 32   ;;  %s3100_s28 = smov 2  }
  0x49   :  { %28 = dma.hbm_to_vmem [thread:$0]  %s3363_s0, 32, %s23_s19, [#allocation3], %s3099_s27, %s3099_s27, %s3100_s28  }
  0x4a   :  { %s3101_s8 = smov [#allocation7]   ;;  %s3102_s10 = smov [#allocation10]  }
  0x4b   :  { %s47_s9 = sshll.u32 %s3101_s8, 4  ;;  %s69_s11 = sshll.u32 %s3102_s10, 4  ;;  %s48_s9 = int_to_ptr.vmem [resolvable:$true] %s47_s9  ;;  %s70_s11 = int_to_ptr.vmem [resolvable:$true] %s69_s11 }
  0x4c   :  { %s2991_s14 = scalar_lea.hbm %s3365_s2, 160 }
  0x4d   :  { %p2992_p4 = scmp.ne.s32.totalorder %s3365_s2, %s2991_s14  ;;  %p2995_p5 = scmp.lt.u32.totalorder %s2991_s14, %s3365_s2 }
  0x4f   :  { %p2997_p6 = pnand %p2995_p5, %p2992_p4 }
  0x51   :  { %3000 = shalt.err (!%p2997_p6)
}
  0x52   :  { %s3001_s0 = scalar_lea.vmem %s48_s9, 160  ;;  %p3006_p8 = scmp.lt.s32.totalorder %s48_s9, %s48_s9 }
  0x53   :  { %p3002_p7 = scmp.ne.s32.totalorder %s48_s9, %s3001_s0  ;;  %p3007_p9 = scmp.lt.s32.totalorder %s3001_s0, %s3001_s0 }
  0x55   :  { %p3008_p10 = por %p3007_p9, %p3006_p8 }
  0x57   :  { %p3009_p11 = pnand %p3008_p10, %p3002_p7 }
  0x59   :  { %3012 = shalt.err (!%p3009_p11)
}
  0x5a   :  { %50 = dma.hbm_to_vmem [thread:$0]  %s3365_s2, 160, %s48_s9, [#allocation6]  }
  0x5b   :  { %s3013_s22 = scalar_lea.hbm %s3367_s4, 48 }
  0x5c   :  { %p3014_p12 = scmp.ne.s32.totalorder %s3367_s4, %s3013_s22  ;;  %p3017_p13 = scmp.lt.u32.totalorder %s3013_s22, %s3367_s4 }
  0x5e   :  { %p3019_p0 = pnand %p3017_p13, %p3014_p12 }
  0x60   :  { %3022 = shalt.err (!%p3019_p0)
}
  0x61   :  { %s3023_s26 = scalar_lea.vmem %s70_s11, 48  ;;  %s3027_s5 = scalar_lea.vmem %s70_s11, 64 }
  0x62   :  { %p3024_p1 = scmp.ne.s32.totalorder %s70_s11, %s3023_s26  ;;  %p3028_p2 = scmp.lt.s32.totalorder %s70_s11, %s70_s11 }
  0x63   :  { %p3029_p3 = scmp.lt.s32.totalorder %s3027_s5, %s3023_s26 }
  0x65   :  { %p3030_p4 = por %p3029_p3, %p3028_p2 }
  0x67   :  { %p3031_p5 = pnand %p3030_p4, %p3024_p1 }
  0x69   :  { %3034 = shalt.err (!%p3031_p5)
}
  0x6a   :  { %72 = dma.hbm_to_vmem [thread:$0]  %s3367_s4, 48, %s70_s11, [#allocation9]  }
  0x6b   :  { %s3103_s30 = smov [#allocation13]   ;;  %s3035_s12 = scalar_lea.hbm %s3369_s6, 16 }
  0x6c   :  { %s91_s8 = sshll.u32 %s3103_s30, 4  ;;  %p3036_p6 = scmp.ne.s32.totalorder %s3369_s6, %s3035_s12  ;;  %s92_s8 = int_to_ptr.vmem [resolvable:$true] %s91_s8 }
  0x6d   :  { %p3039_p7 = scmp.lt.u32.totalorder %s3035_s12, %s3369_s6 }
  0x6f   :  { %p3041_p8 = pnand %p3039_p7, %p3036_p6 }
  0x71   :  { %3044 = shalt.err (!%p3041_p8)
}
  0x72   :  { %s3045_s16 = scalar_lea.vmem %s92_s8, 16  ;;  %s3049_s4 = scalar_lea.vmem %s92_s8, 32 }
  0x73   :  { %p3046_p9 = scmp.ne.s32.totalorder %s92_s8, %s3045_s16  ;;  %p3050_p10 = scmp.lt.s32.totalorder %s92_s8, %s92_s8 }
  0x74   :  { %p3051_p11 = scmp.lt.s32.totalorder %s3049_s4, %s3045_s16 }
  0x76   :  { %p3052_p12 = por %p3051_p11, %p3050_p10 }
  0x78   :  { %p3053_p13 = pnand %p3052_p12, %p3046_p9 }
  0x7a   :  { %3056 = shalt.err (!%p3053_p13)
}
  0x7b   :  { %94 = dma.hbm_to_vmem [thread:$0]  %s3369_s6, 16, %s92_s8, [#allocation12]  }
  0x7c   :  { %3079 = dma.done.wait [#allocation3], 128  }
  0x7d   :  { %3080 = vsyncadd [#allocation3], 4294967168 }
  0x7e   :  { %3081 = dma.done.wait [#allocation6], 5280  }
  0x7f   :  { %3082 = vsyncadd [#allocation6], 4294962016 }
  0x80   :  { %3083 = dma.done.wait [#allocation9], 61488  }
  0x81   :  { %3084 = vsyncadd [#allocation9], 4294905808 }
  0x82   :  { %3085 = dma.done.wait [#allocation12], 6160  }
  0x83   :  { %3086 = vsyncadd [#allocation12], 4294961136  ;;  %v3104_v0 = vmov 0.0   ;;  %v118_v1 = vld [vmem:[#allocation5 + $0x8] sm:$0xff]  ;;  %v128_v2 = vld [vmem:[#allocation5 + $0x58] sm:$0xff]  ;;  %vm211_vm0 = vcmask 261120  }
  0x84   :  { %279 = vmatprep.mubr.f32.mxu1 %v3104_v0  ;;  %563 = vmatprep.mubr.f32.mxu0 %v3104_v0  ;;  %v117_v3 = vld [vmem:[#allocation5] sm:$0xff]  ;;  %v2270_v4 = vpack.c.bf16 %v128_v2, %v118_v1  ;;  %v127_v5 = vld [vmem:[#allocation5 + $0x50] sm:$0xff]  ;;  %v138_v6 = vld [vmem:[#allocation5 + $0xa8] sm:$0xff]  ;;  %vm3106_vm1 = vmmov 0  }
  0x85   :  { %v148_v7 = vld [vmem:[#allocation5 + $0xf8] sm:$0xff]  ;;  %v2272_v8 = vpack.c.bf16 %v127_v5, %v117_v3  ;;  %v137_v10 = vld [vmem:[#allocation5 + $0xa0] sm:$0xff]  ;;  %v147_v11 = vld [vmem:[#allocation5 + $0xf0] sm:$0xff] }
  0x86   :  { %v2274_v9 = vpack.c.bf16 %v148_v7, %v138_v6  ;;  %2271 = vmatprep.subr.bf16.mxu1 %v2270_v4  ;;  %v120_v12 = vld [vmem:[#allocation5 + $0x18] sm:$0xff]  ;;  %v130_v13 = vld [vmem:[#allocation5 + $0x68] sm:$0xff]  ;;  %v2276_v14 = vpack.c.bf16 %v147_v11, %v137_v10  ;;  %v119_v16 = vld [vmem:[#allocation5 + $0x10] sm:$0xff] }
  0x87   :  { %2273 = vmatpush1.bf16.msra.mxu1 %v2272_v8  ;;  %v2278_v15 = vpack.c.bf16 %v130_v13, %v120_v12  ;;  %v129_v17 = vld [vmem:[#allocation5 + $0x60] sm:$0xff]  ;;  %v140_v18 = vld [vmem:[#allocation5 + $0xb8] sm:$0xff]  ;;  %v150_v19 = vld [vmem:[#allocation5 + $0x108] sm:$0xff] }
  0x88   :  { %2275 = vmatprep.subr.bf16.mxu1 %v2274_v9  ;;  %v3237_v20 = vld [vmem:[#allocation2] sm:$0xff]  ;;  %v2280_v21 = vpack.c.bf16 %v129_v17, %v119_v16  ;;  %v2282_v22 = vpack.c.bf16 %v150_v19, %v140_v18  ;;  %v139_v23 = vld [vmem:[#allocation5 + $0xb0] sm:$0xff]  ;;  %v149_v24 = vld [vmem:[#allocation5 + $0x100] sm:$0xff] }
  0x89   :  { %v122_v25 = vld [vmem:[#allocation5 + $0x28] sm:$0xff]  ;;  %v132_v26 = vld [vmem:[#allocation5 + $0x78] sm:$0xff]  ;;  %v121_v27 = vld [vmem:[#allocation5 + $0x20] sm:$0xff]  ;;  %v2284_v32 = vpack.c.bf16 %v149_v24, %v139_v23 }
  0x8a   :  { %v131_v28 = vld [vmem:[#allocation5 + $0x70] sm:$0xff]  ;;  %v126_v29 = vld [vmem:[#allocation5 + $0x48] sm:$0xff]  ;;  %v136_v30 = vld [vmem:[#allocation5 + $0x98] sm:$0xff]  ;;  %v2286_v37 = vpack.c.bf16 %v132_v26, %v122_v25 }
  0x8b   :  { %2277 = vmatpush1.bf16.msra.mxu1 %v2276_v14  ;;  %v125_v31 = vld [vmem:[#allocation5 + $0x40] sm:$0xff]  ;;  %v2302_v33 = vpack.c.bf16 %v136_v30, %v126_v29  ;;  %v135_v34 = vld [vmem:[#allocation5 + $0x90] sm:$0xff]  ;;  %v146_v35 = vld [vmem:[#allocation5 + $0xe8] sm:$0xff]  ;;  %v2288_v47 = vpack.c.bf16 %v131_v28, %v121_v27 }
  0x8c   :  { %2279 = vmatprep.subr.bf16.mxu1 %v2278_v15  ;;  %v156_v36 = vld [vmem:[#allocation5 + $0x138] sm:$0xff]  ;;  %v142_v38 = vld [vmem:[#allocation5 + $0xc8] sm:$0xff]  ;;  %v2304_v39 = vpack.c.bf16 %v135_v34, %v125_v31  ;;  %v145_v41 = vld [vmem:[#allocation5 + $0xe0] sm:$0xff] }
  0x8d   :  { %v2306_v40 = vpack.c.bf16 %v156_v36, %v146_v35  ;;  %v155_v42 = vld [vmem:[#allocation5 + $0x130] sm:$0xff]  ;;  %v152_v43 = vld [vmem:[#allocation5 + $0x118] sm:$0xff]  ;;  %2303 = vmatprep.subr.bf16.mxu0 %v2302_v33  ;;  %v141_v48 = vld [vmem:[#allocation5 + $0xc0] sm:$0xff] }
  0x8e   :  { %2002 = vmatmul.mubr.msk.f32.vlgmr.msra.gmra.mrb[0].mxu1 %vm211_vm0, %v3237_v20  ;;  %v581_v44 = vld [vmem:[#allocation8 + $0x8] sm:$0xff]  ;;  %v584_v45 = vld [vmem:[#allocation8 + $0x20] sm:$0xff]  ;;  %2305 = vmatpush1.bf16.msra.mxu0 %v2304_v39  ;;  %v2308_v46 = vpack.c.bf16 %v155_v42, %v145_v41  ;;  %v583_v50 = vld [vmem:[#allocation8 + $0x18] sm:$0xff]  ;;  %v2290_v51 = vpack.c.bf16 %v152_v43, %v142_v38 }
  0x8f   :  { %2281 = vmatpush1.bf16.msra.mxu1 %v2280_v21  ;;  %350 = vmatprep.mubr.f32.mxu1 %v3104_v0  ;;  %v580_v49 = vld [vmem:[#allocation8] sm:$0xff]  ;;  %v2310_v53 = vpack.c.bf16 %v584_v45, %v581_v44  ;;  %v587_v54 = vld [vmem:[#allocation8 + $0x38] sm:$0xff]  ;;  %v590_v55 = vld [vmem:[#allocation8 + $0x50] sm:$0xff] }
  0x90   :  { %2283 = vmatprep.subr.bf16.mxu1 %v2282_v22  ;;  %2307 = vmatprep.subr.bf16.mxu0 %v2306_v40  ;;  %v151_v52 = vld [vmem:[#allocation5 + $0x110] sm:$0xff]  ;;  %v124_v56 = vld [vmem:[#allocation5 + $0x38] sm:$0xff]  ;;  %v134_v57 = vld [vmem:[#allocation5 + $0x88] sm:$0xff]  ;;  %v2312_v58 = vpack.c.bf16 %v583_v50, %v580_v49  ;;  %v2314_v60 = vpack.c.bf16 %v590_v55, %v587_v54 }
  0x91   :  { %v2292_v59 = vpack.c.bf16 %v151_v52, %v141_v48  ;;  %v586_v61 = vld [vmem:[#allocation8 + $0x30] sm:$0xff]  ;;  %v589_v62 = vld [vmem:[#allocation8 + $0x48] sm:$0xff]  ;;  %v2294_v63 = vpack.c.bf16 %v134_v57, %v124_v56  ;;  %v154_v4 = vld [vmem:[#allocation5 + $0x128] sm:$0xff] }
  0x92   :  { %2309 = vmatpush1.bf16.msra.mxu0 %v2308_v46  ;;  %v123_v1 = vld [vmem:[#allocation5 + $0x30] sm:$0xff]  ;;  %v133_v2 = vld [vmem:[#allocation5 + $0x80] sm:$0xff]  ;;  %v144_v3 = vld [vmem:[#allocation5 + $0xd8] sm:$0xff]  ;;  %v2316_v7 = vpack.c.bf16 %v589_v62, %v586_v61 }
  0x93   :  { %2285 = vmatpush1.bf16.msra.mxu1 %v2284_v32  ;;  %2311 = vmatprep.subr.bf16.mxu0 %v2310_v53  ;;  %v593_v5 = vld [vmem:[#allocation8 + $0x68] sm:$0xff]  ;;  %v596_v6 = vld [vmem:[#allocation8 + $0x80] sm:$0xff]  ;;  %v2296_v8 = vpack.c.bf16 %v133_v2, %v123_v1  ;;  %v595_v11 = vld [vmem:[#allocation8 + $0x78] sm:$0xff]  ;;  %v2298_v12 = vpack.c.bf16 %v154_v4, %v144_v3 }
  0x94   :  { %2287 = vmatprep.subr.bf16.mxu1 %v2286_v37  ;;  %v143_v9 = vld [vmem:[#allocation5 + $0xd0] sm:$0xff]  ;;  %v153_v13 = vld [vmem:[#allocation5 + $0x120] sm:$0xff]  ;;  %v2318_v14 = vpack.c.bf16 %v596_v6, %v593_v5 }
  0x95   :  { %2006 = vmatmul.mubr.msk.f32.vlgmr.msra.gmra.mrb[0].mxu0 %vm211_vm0, %v3237_v20  ;;  %v592_v10 = vld [vmem:[#allocation8 + $0x60] sm:$0xff]  ;;  %v599_v15 = vld [vmem:[#allocation8 + $0x98] sm:$0xff]  ;;  %v602_v16 = vld [vmem:[#allocation8 + $0xb0] sm:$0xff]  ;;  %v2300_v21 = vpack.c.bf16 %v153_v13, %v143_v9 }
  0x96   :  { %2003 = vmatmul.mubr.msk.f32.vlgmr.msra.gmra.mrb[2].mxu1 %vm211_vm0, %v3237_v20  ;;  %2313 = vmatpush1.bf16.msra.mxu0 %v2312_v58  ;;  %v677_v17 = vld [vmem:[#allocation8 + $0x308] sm:$0xff]  ;;  %v680_v18 = vld [vmem:[#allocation8 + $0x320] sm:$0xff]  ;;  %v2320_v19 = vpack.c.bf16 %v595_v11, %v592_v10  ;;  %v2322_v23 = vpack.c.bf16 %v602_v16, %v599_v15  ;;  %v598_v24 = vld [vmem:[#allocation8 + $0x90] sm:$0xff] }
  0x97   :  { %2289 = vmatpush1.bf16.msra.mxu1 %v2288_v47  ;;  %421 = vmatprep.mubr.f32.mxu1 %v3104_v0  ;;  %v676_v22 = vld [vmem:[#allocation8 + $0x300] sm:$0xff]  ;;  %v601_v25 = vld [vmem:[#allocation8 + $0xa8] sm:$0xff]  ;;  %v2374_v26 = vpack.c.bf16 %v680_v18, %v677_v17  ;;  %v679_v27 = vld [vmem:[#allocation8 + $0x318] sm:$0xff] }
  0x98   :  { %2291 = vmatprep.subr.bf16.mxu1 %v2290_v51  ;;  %2315 = vmatprep.subr.bf16.mxu0 %v2314_v60  ;;  %v605_v28 = vld [vmem:[#allocation8 + $0xc8] sm:$0xff]  ;;  %v608_v29 = vld [vmem:[#allocation8 + $0xe0] sm:$0xff]  ;;  %v683_v30 = vld [vmem:[#allocation8 + $0x338] sm:$0xff]  ;;  %v2324_v32 = vpack.c.bf16 %v601_v25, %v598_v24  ;;  %v2376_v33 = vpack.c.bf16 %v679_v27, %v676_v22 }
  0x99   :  { %v686_v31 = vld [vmem:[#allocation8 + $0x350] sm:$0xff]  ;;  %v2326_v35 = vpack.c.bf16 %v608_v29, %v605_v28  ;;  %v604_v36 = vld [vmem:[#allocation8 + $0xc0] sm:$0xff]  ;;  %v607_v37 = vld [vmem:[#allocation8 + $0xd8] sm:$0xff] }
  0x9a   :  { %2317 = vmatpush1.bf16.msra.mxu0 %v2316_v7  ;;  %v682_v34 = vld [vmem:[#allocation8 + $0x330] sm:$0xff]  ;;  %v2378_v38 = vpack.c.bf16 %v686_v31, %v683_v30  ;;  %v685_v39 = vld [vmem:[#allocation8 + $0x348] sm:$0xff]  ;;  %v611_v40 = vld [vmem:[#allocation8 + $0xf8] sm:$0xff]  ;;  %v2328_v44 = vpack.c.bf16 %v607_v37, %v604_v36 }
  0x9b   :  { %2293 = vmatpush1.bf16.msra.mxu1 %v2292_v59  ;;  %2319 = vmatprep.subr.bf16.mxu0 %v2318_v14  ;;  %v614_v41 = vld [vmem:[#allocation8 + $0x110] sm:$0xff]  ;;  %v689_v42 = vld [vmem:[#allocation8 + $0x368] sm:$0xff]  ;;  %v692_v43 = vld [vmem:[#allocation8 + $0x380] sm:$0xff]  ;;  %v2380_v45 = vpack.c.bf16 %v685_v39, %v682_v34 }
  0x9c   :  { %2295 = vmatprep.subr.bf16.mxu1 %v2294_v63  ;;  %v688_v46 = vld [vmem:[#allocation8 + $0x360] sm:$0xff]  ;;  %v2330_v47 = vpack.c.bf16 %v614_v41, %v611_v40  ;;  %v610_v48 = vld [vmem:[#allocation8 + $0xf0] sm:$0xff]  ;;  %v613_v49 = vld [vmem:[#allocation8 + $0x108] sm:$0xff]  ;;  %v2382_v50 = vpack.c.bf16 %v692_v43, %v689_v42 }
  0x9d   :  { %v691_v51 = vld [vmem:[#allocation8 + $0x378] sm:$0xff]  ;;  %v617_v52 = vld [vmem:[#allocation8 + $0x128] sm:$0xff]  ;;  %v620_v53 = vld [vmem:[#allocation8 + $0x140] sm:$0xff]  ;;  %v2332_v56 = vpack.c.bf16 %v613_v49, %v610_v48 }
  0x9e   :  { %2004 = vmatmul.mubr.msk.f32.vlgmr.msra.gmra.mrb[4].mxu1 %vm211_vm0, %v3237_v20  ;;  %2321 = vmatpush1.bf16.msra.mxu0 %v2320_v19  ;;  %v695_v54 = vld [vmem:[#allocation8 + $0x398] sm:$0xff]  ;;  %v698_v55 = vld [vmem:[#allocation8 + $0x3b0] sm:$0xff]  ;;  %v2334_v58 = vpack.c.bf16 %v620_v53, %v617_v52  ;;  %v616_v59 = vld [vmem:[#allocation8 + $0x120] sm:$0xff] }
  0x9f   :  { %2297 = vmatpush1.bf16.msra.mxu1 %v2296_v8  ;;  %492 = vmatprep.mubr.f32.mxu1 %v3104_v0  ;;  %v694_v57 = vld [vmem:[#allocation8 + $0x390] sm:$0xff]  ;;  %v619_v60 = vld [vmem:[#allocation8 + $0x138] sm:$0xff]  ;;  %v2386_v61 = vpack.c.bf16 %v698_v55, %v695_v54  ;;  %v697_v62 = vld [vmem:[#allocation8 + $0x3a8] sm:$0xff] }
  0xa0   :  { %2299 = vmatprep.subr.bf16.mxu1 %v2298_v12  ;;  %2323 = vmatprep.subr.bf16.mxu0 %v2322_v23  ;;  %v623_v63 = vld [vmem:[#allocation8 + $0x158] sm:$0xff]  ;;  %v626_v1 = vld [vmem:[#allocation8 + $0x170] sm:$0xff]  ;;  %v701_v2 = vld [vmem:[#allocation8 + $0x3c8] sm:$0xff]  ;;  %v2336_v4 = vpack.c.bf16 %v619_v60, %v616_v59  ;;  %v2388_v5 = vpack.c.bf16 %v697_v62, %v694_v57 }
  0xa1   :  { %v704_v3 = vld [vmem:[#allocation8 + $0x3e0] sm:$0xff]  ;;  %v2338_v7 = vpack.c.bf16 %v626_v1, %v623_v63  ;;  %v622_v8 = vld [vmem:[#allocation8 + $0x150] sm:$0xff]  ;;  %v625_v9 = vld [vmem:[#allocation8 + $0x168] sm:$0xff] }
  0xa2   :  { %2325 = vmatpush1.bf16.msra.mxu0 %v2324_v32  ;;  %v700_v6 = vld [vmem:[#allocation8 + $0x3c0] sm:$0xff]  ;;  %v2390_v10 = vpack.c.bf16 %v704_v3, %v701_v2  ;;  %v703_v11 = vld [vmem:[#allocation8 + $0x3d8] sm:$0xff]  ;;  %v629_v12 = vld [vmem:[#allocation8 + $0x188] sm:$0xff]  ;;  %v2340_v16 = vpack.c.bf16 %v625_v9, %v622_v8 }
  0xa3   :  { %2301 = vmatpush1.bf16.msra.mxu1 %v2300_v21  ;;  %2327 = vmatprep.subr.bf16.mxu0 %v2326_v35  ;;  %v632_v13 = vld [vmem:[#allocation8 + $0x1a0] sm:$0xff]  ;;  %v707_v14 = vld [vmem:[#allocation8 + $0x3f8] sm:$0xff]  ;;  %v710_v15 = vld [vmem:[#allocation8 + $0x410] sm:$0xff]  ;;  %v2392_v17 = vpack.c.bf16 %v703_v11, %v700_v6 }
  0xa4   :  { %2375 = vmatprep.subr.bf16.mxu1 %v2374_v26  ;;  %v706_v18 = vld [vmem:[#allocation8 + $0x3f0] sm:$0xff]  ;;  %v2342_v19 = vpack.c.bf16 %v632_v13, %v629_v12  ;;  %v628_v21 = vld [vmem:[#allocation8 + $0x180] sm:$0xff]  ;;  %v631_v22 = vld [vmem:[#allocation8 + $0x198] sm:$0xff]  ;;  %v2394_v23 = vpack.c.bf16 %v710_v15, %v707_v14 }
  0xa5   :  { %v709_v24 = vld [vmem:[#allocation8 + $0x408] sm:$0xff]  ;;  %v635_v25 = vld [vmem:[#allocation8 + $0x1b8] sm:$0xff]  ;;  %v638_v26 = vld [vmem:[#allocation8 + $0x1d0] sm:$0xff]  ;;  %v2344_v29 = vpack.c.bf16 %v631_v22, %v628_v21 }
  0xa6   :  { %2005 = vmatmul.mubr.msk.f32.vlgmr.msra.gmra.mrb[6].mxu1 %vm211_vm0, %v3237_v20  ;;  %2329 = vmatpush1.bf16.msra.mxu0 %v2328_v44  ;;  %v2384_v20 = vpack.c.bf16 %v691_v51, %v688_v46  ;;  %v713_v27 = vld [vmem:[#allocation8 + $0x428] sm:$0xff]  ;;  %v716_v28 = vld [vmem:[#allocation8 + $0x440] sm:$0xff]  ;;  %v2396_v30 = vpack.c.bf16 %v709_v24, %v706_v18  ;;  %v2346_v32 = vpack.c.bf16 %v638_v26, %v635_v25  ;;  %v715_v36 = vld [vmem:[#allocation8 + $0x438] sm:$0xff] }
  0xa7   :  { %2377 = vmatpush1.bf16.msra.mxu1 %v2376_v33  ;;  %2331 = vmatprep.subr.bf16.mxu0 %v2330_v47  ;;  %v712_v31 = vld [vmem:[#allocation8 + $0x420] sm:$0xff]  ;;  %v634_v33 = vld [vmem:[#allocation8 + $0x1b0] sm:$0xff]  ;;  %v637_v34 = vld [vmem:[#allocation8 + $0x1c8] sm:$0xff]  ;;  %v2398_v35 = vpack.c.bf16 %v716_v28, %v713_v27 }
  0xa8   :  { %2379 = vmatprep.subr.bf16.mxu1 %v2378_v38  ;;  %v641_v37 = vld [vmem:[#allocation8 + $0x1e8] sm:$0xff]  ;;  %v644_v38 = vld [vmem:[#allocation8 + $0x200] sm:$0xff]  ;;  %v719_v39 = vld [vmem:[#allocation8 + $0x458] sm:$0xff]  ;;  %v2348_v41 = vpack.c.bf16 %v637_v34, %v634_v33  ;;  %v2400_v42 = vpack.c.bf16 %v715_v36, %v712_v31 }
  0xa9   :  { %v722_v40 = vld [vmem:[#allocation8 + $0x470] sm:$0xff]  ;;  %v2350_v44 = vpack.c.bf16 %v644_v38, %v641_v37  ;;  %v643_v46 = vld [vmem:[#allocation8 + $0x1f8] sm:$0xff]  ;;  %v721_v48 = vld [vmem:[#allocation8 + $0x468] sm:$0xff] }
  0xaa   :  { %2333 = vmatpush1.bf16.msra.mxu0 %v2332_v56  ;;  %v718_v43 = vld [vmem:[#allocation8 + $0x450] sm:$0xff]  ;;  %v2402_v47 = vpack.c.bf16 %v722_v40, %v719_v39  ;;  %v647_v49 = vld [vmem:[#allocation8 + $0x218] sm:$0xff]  ;;  %v725_v51 = vld [vmem:[#allocation8 + $0x488] sm:$0xff] }
  0xab   :  { %2381 = vmatpush1.bf16.msra.mxu1 %v2380_v45  ;;  %2335 = vmatprep.subr.bf16.mxu0 %v2334_v58  ;;  %v640_v45 = vld [vmem:[#allocation8 + $0x1e0] sm:$0xff]  ;;  %v2404_v54 = vpack.c.bf16 %v721_v48, %v718_v43  ;;  %v649_v57 = vld [vmem:[#allocation8 + $0x228] sm:$0xff]  ;;  %v727_v59 = vld [vmem:[#allocation8 + $0x498] sm:$0xff] }
  0xac   :  { %2383 = vmatprep.subr.bf16.mxu1 %v2382_v50  ;;  %v650_v50 = vld [vmem:[#allocation8 + $0x230] sm:$0xff]  ;;  %v728_v52 = vld [vmem:[#allocation8 + $0x4a0] sm:$0xff]  ;;  %v2352_v53 = vpack.c.bf16 %v643_v46, %v640_v45  ;;  %v653_v60 = vld [vmem:[#allocation8 + $0x248] sm:$0xff] }
  0xad   :  { %v724_v55 = vld [vmem:[#allocation8 + $0x480] sm:$0xff]  ;;  %v2354_v56 = vpack.c.bf16 %v650_v50, %v647_v49  ;;  %v2406_v58 = vpack.c.bf16 %v728_v52, %v725_v51  ;;  %v731_v62 = vld [vmem:[#allocation8 + $0x4b8] sm:$0xff]  ;;  %v734_v63 = vld [vmem:[#allocation8 + $0x4d0] sm:$0xff] }
  0xae   :  { %2337 = vmatpush1.bf16.msra.mxu0 %v2336_v4  ;;  %v2408_v2 = vpack.c.bf16 %v727_v59, %v724_v55  ;;  %v2410_v4 = vpack.c.bf16 %v734_v63, %v731_v62  ;;  %v733_v6 = vld [vmem:[#allocation8 + $0x4c8] sm:$0xff]  ;;  %v740_v8 = vld [vmem:[#allocation8 + $0x500] sm:$0xff]  ;;  %v655_v12 = vld [vmem:[#allocation8 + $0x258] sm:$0xff] }
  0xaf   :  { %2385 = vmatpush1.bf16.msra.mxu1 %v2384_v20  ;;  %2339 = vmatprep.subr.bf16.mxu0 %v2338_v7  ;;  %v646_v20 = vld [vmem:[#allocation8 + $0x210] sm:$0xff]  ;;  %v737_v7 = vld [vmem:[#allocation8 + $0x4e8] sm:$0xff]  ;;  %v652_v11 = vld [vmem:[#allocation8 + $0x240] sm:$0xff] }
  0xb0   :  { %2387 = vmatprep.subr.bf16.mxu1 %v2386_v61  ;;  %v656_v61 = vld [vmem:[#allocation8 + $0x260] sm:$0xff]  ;;  %v2356_v1 = vpack.c.bf16 %v649_v57, %v646_v20  ;;  %v2360_v14 = vpack.c.bf16 %v655_v12, %v652_v11  ;;  %v739_v15 = vld [vmem:[#allocation8 + $0x4f8] sm:$0xff]  ;;  %v662_v18 = vld [vmem:[#allocation8 + $0x290] sm:$0xff] }
  0xb1   :  { %v2358_v3 = vpack.c.bf16 %v656_v61, %v653_v60  ;;  %v736_v13 = vld [vmem:[#allocation8 + $0x4e0] sm:$0xff]  ;;  %v746_v22 = vld [vmem:[#allocation8 + $0x530] sm:$0xff]  ;;  %v661_v24 = vld [vmem:[#allocation8 + $0x288] sm:$0xff] }
  0xb2   :  { %2341 = vmatpush1.bf16.msra.mxu0 %v2340_v16  ;;  %v2416_v16 = vpack.c.bf16 %v739_v15, %v736_v13  ;;  %v742_v27 = vld [vmem:[#allocation8 + $0x510] sm:$0xff]  ;;  %v745_v28 = vld [vmem:[#allocation8 + $0x528] sm:$0xff]  ;;  %v668_v31 = vld [vmem:[#allocation8 + $0x2c0] sm:$0xff] }
  0xb3   :  { %2389 = vmatpush1.bf16.msra.mxu1 %v2388_v5  ;;  %2343 = vmatprep.subr.bf16.mxu0 %v2342_v19  ;;  %v730_v5 = vld [vmem:[#allocation8 + $0x4b0] sm:$0xff]  ;;  %v743_v19 = vld [vmem:[#allocation8 + $0x518] sm:$0xff]  ;;  %v752_v34 = vld [vmem:[#allocation8 + $0x560] sm:$0xff] }
  0xb4   :  { %2391 = vmatprep.subr.bf16.mxu1 %v2390_v10  ;;  %v2412_v9 = vpack.c.bf16 %v733_v6, %v730_v5  ;;  %v2414_v10 = vpack.c.bf16 %v740_v8, %v737_v7  ;;  %v2418_v25 = vpack.c.bf16 %v746_v22, %v743_v19  ;;  %v667_v36 = vld [vmem:[#allocation8 + $0x2b8] sm:$0xff]  ;;  %v748_v39 = vld [vmem:[#allocation8 + $0x540] sm:$0xff]  ;;  %v674_v43 = vld [vmem:[#allocation8 + $0x2f0] sm:$0xff]  ;;  %v161_v8 = vlaneseq }
  0xb5   :  { %v751_v40 = vld [vmem:[#allocation8 + $0x558] sm:$0xff]  ;;  %v758_v46 = vld [vmem:[#allocation8 + $0x590] sm:$0xff]  ;;  %v673_v48 = vld [vmem:[#allocation8 + $0x2e8] sm:$0xff] }
  0xb6   :  { %2345 = vmatpush1.bf16.msra.mxu0 %v2344_v29  ;;  %v2420_v29 = vpack.c.bf16 %v745_v28, %v742_v27  ;;  %v754_v51 = vld [vmem:[#allocation8 + $0x570] sm:$0xff]  ;;  %v757_v52 = vld [vmem:[#allocation8 + $0x588] sm:$0xff]  ;;  %v764_v55 = vld [vmem:[#allocation8 + $0x5c0] sm:$0xff] }
  0xb7   :  { %2393 = vmatpush1.bf16.msra.mxu1 %v2392_v17  ;;  %2347 = vmatprep.subr.bf16.mxu0 %v2346_v32  ;;  %v659_v17 = vld [vmem:[#allocation8 + $0x278] sm:$0xff]  ;;  %v749_v32 = vld [vmem:[#allocation8 + $0x548] sm:$0xff]  ;;  %v770_v63 = vld [vmem:[#allocation8 + $0x5f0] sm:$0xff] }
  0xb8   :  { %2395 = vmatprep.subr.bf16.mxu1 %v2394_v23  ;;  %v2362_v21 = vpack.c.bf16 %v662_v18, %v659_v17  ;;  %v658_v23 = vld [vmem:[#allocation8 + $0x270] sm:$0xff]  ;;  %v2422_v37 = vpack.c.bf16 %v752_v34, %v749_v32  ;;  %v633_v57 = vld [vmem:[#allocation8 + $0x1a8] sm:$0xff]  ;;  %v763_v59 = vld [vmem:[#allocation8 + $0x5b8] sm:$0xff] }
  0xb9   :  { %v2364_v26 = vpack.c.bf16 %v661_v24, %v658_v23  ;;  %v767_v62 = vld [vmem:[#allocation8 + $0x5d8] sm:$0xff]  ;;  %v773_v5 = vld [vmem:[#allocation8 + $0x608] sm:$0xff]  ;;  %v776_v6 = vld [vmem:[#allocation8 + $0x620] sm:$0xff] }
  0xba   :  { %2349 = vmatpush1.bf16.msra.mxu0 %v2348_v41  ;;  %v2424_v41 = vpack.c.bf16 %v751_v40, %v748_v39  ;;  %v2438_v7 = vpack.c.bf16 %v776_v6, %v773_v5  ;;  %v3257_v11 = vld [vmem:[#allocation7] sm:$0xff] }
  0xbb   :  { %2397 = vmatpush1.bf16.msra.mxu1 %v2396_v30  ;;  %2351 = vmatprep.subr.bf16.mxu0 %v2350_v44  ;;  %v665_v30 = vld [vmem:[#allocation8 + $0x2a8] sm:$0xff]  ;;  %v755_v44 = vld [vmem:[#allocation8 + $0x578] sm:$0xff]  ;;  %v582_v28 = vld [vmem:[#allocation8 + $0x10] sm:$0xff] }
  0xbc   :  { %2399 = vmatprep.subr.bf16.mxu1 %v2398_v35  ;;  %v2366_v33 = vpack.c.bf16 %v668_v31, %v665_v30  ;;  %v664_v35 = vld [vmem:[#allocation8 + $0x2a0] sm:$0xff]  ;;  %v2426_v49 = vpack.c.bf16 %v758_v46, %v755_v44  ;;  %v639_v32 = vld [vmem:[#allocation8 + $0x1d8] sm:$0xff]  ;;  %v642_v40 = vld [vmem:[#allocation8 + $0x1f0] sm:$0xff] }
  0xbd   :  { %v2368_v38 = vpack.c.bf16 %v667_v36, %v664_v35  ;;  %v636_v31 = vld [vmem:[#allocation8 + $0x1c0] sm:$0xff] }
  0xbe   :  { %2353 = vmatpush1.bf16.msra.mxu0 %v2352_v53  ;;  %v2428_v53 = vpack.c.bf16 %v757_v52, %v754_v51  ;;  %v2634_v36 = vpack.c.bf16 %v639_v32, %v636_v31  ;;  %v772_v44 = vld [vmem:[#allocation8 + $0x600] sm:$0xff]  ;;  %v782_v52 = vld [vmem:[#allocation8 + $0x650] sm:$0xff] }
  0xbf   :  { %2401 = vmatpush1.bf16.msra.mxu1 %v2400_v42  ;;  %2355 = vmatprep.subr.bf16.mxu0 %v2354_v56  ;;  %v671_v42 = vld [vmem:[#allocation8 + $0x2d8] sm:$0xff]  ;;  %v630_v56 = vld [vmem:[#allocation8 + $0x190] sm:$0xff] }
  0xc0   :  { %2403 = vmatprep.subr.bf16.mxu1 %v2402_v47  ;;  %v2370_v45 = vpack.c.bf16 %v674_v43, %v671_v42  ;;  %v670_v47 = vld [vmem:[#allocation8 + $0x2d0] sm:$0xff]  ;;  %v2630_v60 = vpack.c.bf16 %v633_v57, %v630_v56  ;;  %v781_v57 = vld [vmem:[#allocation8 + $0x648] sm:$0xff] }
  0xc1   :  { %v2372_v50 = vpack.c.bf16 %v673_v48, %v670_v47  ;;  %v594_v48 = vld [vmem:[#allocation8 + $0x70] sm:$0xff] }
  0xc2   :  { %2357 = vmatpush1.bf16.msra.mxu0 %v2356_v1  ;;  %v2434_v1 = vpack.c.bf16 %v770_v63, %v767_v62  ;;  %v603_v62 = vld [vmem:[#allocation8 + $0xb8] sm:$0xff]  ;;  %v785_v63 = vld [vmem:[#allocation8 + $0x668] sm:$0xff] }
  0xc3   :  { %2405 = vmatpush1.bf16.msra.mxu1 %v2404_v54  ;;  %2359 = vmatprep.subr.bf16.mxu0 %v2358_v3  ;;  %v761_v54 = vld [vmem:[#allocation8 + $0x5a8] sm:$0xff] }
  0xc4   :  { %2407 = vmatprep.subr.bf16.mxu1 %v2406_v58  ;;  %v2430_v20 = vpack.c.bf16 %v764_v55, %v761_v54  ;;  %v760_v58 = vld [vmem:[#allocation8 + $0x5a0] sm:$0xff]  ;;  %v769_v3 = vld [vmem:[#allocation8 + $0x5e8] sm:$0xff]  ;;  %v651_v54 = vld [vmem:[#allocation8 + $0x238] sm:$0xff] }
  0xc5   :  { %v2432_v61 = vpack.c.bf16 %v763_v59, %v760_v58 }
  0xc6   :  { %2361 = vmatpush1.bf16.msra.mxu0 %v2360_v14 }
  0xc7   :  { %2409 = vmatpush1.bf16.msra.mxu1 %v2408_v2  ;;  %2363 = vmatprep.subr.bf16.mxu0 %v2362_v21  ;;  %v766_v2 = vld [vmem:[#allocation8 + $0x5d0] sm:$0xff] }
  0xc8   :  { %2411 = vmatprep.subr.bf16.mxu1 %v2410_v4  ;;  %v2436_v4 = vpack.c.bf16 %v769_v3, %v766_v2  ;;  %v788_v2 = vld [vmem:[#allocation8 + $0x680] sm:$0xff]  ;;  %v654_v3 = vld [vmem:[#allocation8 + $0x250] sm:$0xff] }
  0xca   :  { %2365 = vmatpush1.bf16.msra.mxu0 %v2364_v26 }
  0xcb   :  { %2413 = vmatpush1.bf16.msra.mxu1 %v2412_v9  ;;  %2367 = vmatprep.subr.bf16.mxu0 %v2366_v33  ;;  %v3252_v9 = vshrl.u32 %v161_v8, 7  ;;  %v784_v8 = vld [vmem:[#allocation8 + $0x660] sm:$0xff] }
  0xcc   :  { %2415 = vmatprep.subr.bf16.mxu1 %v2414_v10 }
  0xcd   :  { %v3255_v10 = vsub.s32 0, %v3252_v9  ;;  %v3260_v12 = vsub.s32 1, %v3252_v9  ;;  %v171_v18 = vsub.s32 2, %v3252_v9  ;;  %v175_v21 = vsub.s32 3, %v3252_v9 }
  0xce   :  { %2369 = vmatpush1.bf16.msra.mxu0 %v2368_v38  ;;  %v183_v30 = vsub.s32 5, %v3252_v9  ;;  %v591_v38 = vld [vmem:[#allocation8 + $0x58] sm:$0xff] }
  0xcf   :  { %2417 = vmatpush1.bf16.msra.mxu1 %v2416_v16  ;;  %2371 = vmatprep.subr.bf16.mxu0 %v2370_v45  ;;  %v164_v13 = vrot.slane %v3257_v11, %v3255_v10  ;;  %v168_v14 = vrot.slane %v3257_v11, %v3260_v12  ;;  %v172_v22 = vrot.slane %v3257_v11, %v171_v18  ;;  %v775_v45 = vld [vmem:[#allocation8 + $0x618] sm:$0xff] }
  0xd0   :  { %2419 = vmatprep.subr.bf16.mxu1 %v2418_v25  ;;  %v176_v23 = vrot.slane %v3257_v11, %v175_v21  ;;  %v184_v39 = vrot.slane %v3257_v11, %v183_v30  ;;  %v2440_v55 = vpack.c.bf16 %v775_v45, %v772_v44  ;;  %v791_v21 = vld [vmem:[#allocation8 + $0x698] sm:$0xff]  ;;  %v796_v44 = vld [vmem:[#allocation8 + $0x6c0] sm:$0xff] }
  0xd1   :  { %v799_v45 = vld [vmem:[#allocation8 + $0x6d8] sm:$0xff] }
  0xd2   :  { %2373 = vmatpush1.bf16.msra.mxu0 %v2372_v50  ;;  %v779_v50 = vld [vmem:[#allocation8 + $0x638] sm:$0xff] }
  0xd3   :  { %2421 = vmatpush1.bf16.msra.mxu1 %v2420_v29  ;;  %2631 = vmatprep.subr.bf16.mxu0 %v2630_v60  ;;  %v585_v29 = vld [vmem:[#allocation8 + $0x28] sm:$0xff]  ;;  %v2442_v59 = vpack.c.bf16 %v782_v52, %v779_v50  ;;  %v803_v50 = vld [vmem:[#allocation8 + $0x6f8] sm:$0xff]  ;;  %v672_v52 = vld [vmem:[#allocation8 + $0x2e0] sm:$0xff] }
  0xd4   :  { %2423 = vmatprep.subr.bf16.mxu1 %v2422_v37  ;;  %v2632_v34 = vpack.c.bf16 %v585_v29, %v582_v28  ;;  %v588_v37 = vld [vmem:[#allocation8 + $0x40] sm:$0xff]  ;;  %v793_v28 = vld [vmem:[#allocation8 + $0x6a8] sm:$0xff] }
  0xd5   :  { %v2636_v43 = vpack.c.bf16 %v591_v38, %v588_v37  ;;  %v800_v38 = vld [vmem:[#allocation8 + $0x6e0] sm:$0xff] }
  0xd7   :  { %2425 = vmatpush1.bf16.msra.mxu1 %v2424_v41  ;;  %v645_v41 = vld [vmem:[#allocation8 + $0x208] sm:$0xff] }
  0xd8   :  { %2427 = vmatprep.subr.bf16.mxu1 %v2426_v49  ;;  %v2638_v47 = vpack.c.bf16 %v645_v41, %v642_v40  ;;  %v597_v49 = vld [vmem:[#allocation8 + $0x88] sm:$0xff] }
  0xd9   :  { %v2640_v56 = vpack.c.bf16 %v597_v49, %v594_v48  ;;  %v669_v40 = vld [vmem:[#allocation8 + $0x2c8] sm:$0xff]  ;;  %v618_v48 = vld [vmem:[#allocation8 + $0x130] sm:$0xff] }
  0xda   :  { %v621_v49 = vld [vmem:[#allocation8 + $0x148] sm:$0xff] }
  0xdb   :  { %2429 = vmatpush1.bf16.msra.mxu1 %v2428_v53  ;;  %v648_v53 = vld [vmem:[#allocation8 + $0x220] sm:$0xff] }
  0xdc   :  { %2431 = vmatprep.subr.bf16.mxu1 %v2430_v20  ;;  %v778_v20 = vld [vmem:[#allocation8 + $0x630] sm:$0xff]  ;;  %v2642_v60 = vpack.c.bf16 %v651_v54, %v648_v53  ;;  %v675_v53 = vld [vmem:[#allocation8 + $0x2f8] sm:$0xff]  ;;  %v2456_v54 = vpack.c.bf16 %v799_v45, %v796_v44 }
  0xdd   :  { %v2444_v6 = vpack.c.bf16 %v781_v57, %v778_v20  ;;  %v805_v20 = vld [vmem:[#allocation8 + $0x708] sm:$0xff]  ;;  %v823_v44 = vld [vmem:[#allocation8 + $0x798] sm:$0xff] }
  0xdf   :  { %2433 = vmatpush1.bf16.msra.mxu1 %v2432_v61  ;;  %v600_v61 = vld [vmem:[#allocation8 + $0xa0] sm:$0xff] }
  0xe0   :  { %2435 = vmatprep.subr.bf16.mxu1 %v2434_v1 }
  0xe3   :  { %2437 = vmatpush1.bf16.msra.mxu1 %v2436_v4  ;;  %v657_v4 = vld [vmem:[#allocation8 + $0x268] sm:$0xff] }
  0xe4   :  { %2439 = vmatprep.subr.bf16.mxu1 %v2438_v7  ;;  %v2644_v7 = vpack.c.bf16 %v603_v62, %v600_v61  ;;  %v627_v61 = vld [vmem:[#allocation8 + $0x178] sm:$0xff]  ;;  %v809_v62 = vld [vmem:[#allocation8 + $0x728] sm:$0xff] }
 0x161   :  { %v281_v15 = vpop.f32.mrb[0].mxu1 }
 0x162   :  { %v282_v16 = vadd.f32 %v281_v15, %v164_v13  ;;  %v283_v17 = vpop.f32.mrb[1].mxu1  ;;  %v787_v13 = vld [vmem:[#allocation8 + $0x678] sm:$0xff]  ;;  %v2446_v15 = vpack.c.bf16 %v788_v2, %v785_v63  ;;  %v812_v63 = vld [vmem:[#allocation8 + $0x740] sm:$0xff]  ;;  %v726_v2 = vld [vmem:[#allocation8 + $0x490] sm:$0xff] }
 0x163   :  { %v284_v19 = vadd.f32 %v283_v17, %v168_v14  ;;  %v606_v17 = vld [vmem:[#allocation8 + $0xd0] sm:$0xff] }
 0x164   :  { %2875 = vtanh.f32 %v282_v16  ;;  %v2646_v16 = vpack.c.bf16 %v657_v4, %v654_v3  ;;  %v729_v3 = vld [vmem:[#allocation8 + $0x4a8] sm:$0xff] }
 0x165   :  { %2877 = vtanh.f32 %v284_v19  ;;  %v609_v19 = vld [vmem:[#allocation8 + $0xe8] sm:$0xff] }
 0x168   :  { %v3289_v29 = vpop.f32.mrb[0].mxu0 }
 0x169   :  { %v352_v24 = vpop.f32.mrb[2].mxu1  ;;  %v3293_v37 = vpop.f32.mrb[1].mxu0 }
 0x16a   :  { %v353_v25 = vadd.f32 %v352_v24, %v172_v22  ;;  %v354_v26 = vpop.f32.mrb[3].mxu1  ;;  %v794_v22 = vld [vmem:[#allocation8 + $0x6b0] sm:$0xff]  ;;  %v663_v24 = vld [vmem:[#allocation8 + $0x298] sm:$0xff] }
 0x16b   :  { %v355_v27 = vadd.f32 %v354_v26, %v176_v23  ;;  %v660_v23 = vld [vmem:[#allocation8 + $0x280] sm:$0xff]  ;;  %v2648_v26 = vpack.c.bf16 %v609_v19, %v606_v17  ;;  %v2450_v31 = vpack.c.bf16 %v794_v22, %v791_v21  ;;  %v681_v17 = vld [vmem:[#allocation8 + $0x328] sm:$0xff]  ;;  %v815_v19 = vld [vmem:[#allocation8 + $0x758] sm:$0xff] }
 0x16c   :  { %v2650_v32 = vpack.c.bf16 %v663_v24, %v660_v23  ;;  %v818_v21 = vld [vmem:[#allocation8 + $0x770] sm:$0xff]  ;;  %v732_v22 = vld [vmem:[#allocation8 + $0x4c0] sm:$0xff]  ;;  %v735_v23 = vld [vmem:[#allocation8 + $0x4d8] sm:$0xff] }
 0x16d   :  { %2879 = vtanh.f32 %v355_v27  ;;  %v790_v27 = vld [vmem:[#allocation8 + $0x690] sm:$0xff] }
 0x16e   :  { %v3273_v33 = vpop.eup %2875  ;;  %2881 = vtanh.f32 %v353_v25  ;;  %v2448_v25 = vpack.c.bf16 %v787_v13, %v784_v8  ;;  %v2452_v41 = vpack.c.bf16 %v793_v28, %v790_v27  ;;  %v2462_v8 = vpack.c.bf16 %v812_v63, %v809_v62  ;;  %v817_v27 = vld [vmem:[#allocation8 + $0x768] sm:$0xff] }
 0x16f   :  { %v2878_v35 = vpop.eup %2877  ;;  %v2662_v13 = vpack.c.bf16 %v729_v3, %v726_v2  ;;  %v2466_v28 = vpack.c.bf16 %v818_v21, %v815_v19  ;;  %v753_v62 = vld [vmem:[#allocation8 + $0x568] sm:$0xff]  ;;  %v832_v3 = vld [vmem:[#allocation8 + $0x7e0] sm:$0xff]  ;;  %v759_v19 = vld [vmem:[#allocation8 + $0x598] sm:$0xff] }
 0x170   :  { %1141 = vmatprep.mubr.f32.mxu0 %v2878_v35 }
 0x171   :  { %1142 = vmatmul.mubr.f32.vlgmr.msra.gmra.mrb[2].mxu0 %v3273_v33  ;;  %v3277_v42 = vpop.f32.mrb[4].mxu1 }
 0x172   :  { %2633 = vmatpush3.bf16.msra.mxu0 %v2632_v34  ;;  %1496 = vmatprep.mubr.f32.mxu0 %v2878_v35  ;;  %v425_v46 = vpop.f32.mrb[5].mxu1  ;;  %v612_v34 = vld [vmem:[#allocation8 + $0x100] sm:$0xff]  ;;  %v615_v35 = vld [vmem:[#allocation8 + $0x118] sm:$0xff] }
 0x173   :  { %2635 = vmatprep.subr.bf16.mxu0 %v2634_v36  ;;  %v426_v51 = vadd.f32 %v425_v46, %v184_v39  ;;  %v797_v36 = vld [vmem:[#allocation8 + $0x6c8] sm:$0xff]  ;;  %v666_v39 = vld [vmem:[#allocation8 + $0x2b0] sm:$0xff] }
 0x174   :  { %v2454_v46 = vpack.c.bf16 %v800_v38, %v797_v36  ;;  %v824_v36 = vld [vmem:[#allocation8 + $0x7a0] sm:$0xff]  ;;  %v738_v38 = vld [vmem:[#allocation8 + $0x4f0] sm:$0xff] }
 0x175   :  { %2883 = vtanh.f32 %v426_v51  ;;  %v806_v51 = vld [vmem:[#allocation8 + $0x710] sm:$0xff] }
 0x176   :  { %2637 = vmatpush3.bf16.msra.mxu0 %v2636_v43  ;;  %v2652_v43 = vpack.c.bf16 %v615_v35, %v612_v34  ;;  %v2458_v57 = vpack.c.bf16 %v806_v51, %v803_v50  ;;  %v821_v34 = vld [vmem:[#allocation8 + $0x788] sm:$0xff]  ;;  %v2666_v35 = vpack.c.bf16 %v735_v23, %v732_v22  ;;  %v830_v50 = vld [vmem:[#allocation8 + $0x7d0] sm:$0xff]  ;;  %v744_v51 = vld [vmem:[#allocation8 + $0x520] sm:$0xff] }
 0x177   :  { %v3279_v58 = vpop.eup %2879  ;;  %2639 = vmatprep.subr.bf16.mxu0 %v2638_v47  ;;  %v2654_v47 = vpack.c.bf16 %v669_v40, %v666_v39  ;;  %v741_v39 = vld [vmem:[#allocation8 + $0x508] sm:$0xff]  ;;  %v2470_v45 = vpack.c.bf16 %v824_v36, %v821_v34  ;;  %v838_v23 = vld [vmem:[#allocation8 + $0x810] sm:$0xff]  ;;  %v848_v34 = vld [vmem:[#allocation8 + $0x860] sm:$0xff] }
 0x178   :  { %v3281_v1 = vpop.eup %2881  ;;  %1212 = vmatprep.mubr.f32.mxu1 %v3279_v58  ;;  %v765_v36 = vld [vmem:[#allocation8 + $0x5c8] sm:$0xff] }
 0x179   :  { %1213 = vmatmul.mubr.f32.vlgmr.msra.gmra.mrb[8].mxu1 %v3281_v1  ;;  %v3285_v5 = vpop.f32.mrb[6].mxu1 }
 0x17a   :  { %2441 = vmatpush1.bf16.msra.mxu1 %v2440_v55  ;;  %2641 = vmatpush3.bf16.msra.mxu0 %v2640_v56  ;;  %v3287_v14 = vpop.f32.mrb[7].mxu1  ;;  %v2656_v55 = vpack.c.bf16 %v621_v49, %v618_v48  ;;  %v802_v56 = vld [vmem:[#allocation8 + $0x6f0] sm:$0xff]  ;;  %v693_v48 = vld [vmem:[#allocation8 + $0x388] sm:$0xff]  ;;  %v827_v49 = vld [vmem:[#allocation8 + $0x7b8] sm:$0xff] }
 0x17b   :  { %2443 = vmatprep.subr.bf16.mxu1 %v2442_v59  ;;  %2643 = vmatprep.subr.bf16.mxu0 %v2642_v60  ;;  %v2658_v59 = vpack.c.bf16 %v675_v53, %v672_v52  ;;  %v624_v60 = vld [vmem:[#allocation8 + $0x160] sm:$0xff]  ;;  %v2460_v4 = vpack.c.bf16 %v805_v20, %v802_v56  ;;  %v747_v52 = vld [vmem:[#allocation8 + $0x538] sm:$0xff]  ;;  %v2474_v56 = vpack.c.bf16 %v830_v50, %v827_v49  ;;  %v854_v49 = vld [vmem:[#allocation8 + $0x890] sm:$0xff] }
 0x17c   :  { %v696_v20 = vld [vmem:[#allocation8 + $0x3a0] sm:$0xff] }
 0x17d   :  { %v768_v50 = vld [vmem:[#allocation8 + $0x5e0] sm:$0xff] }
 0x17e   :  { %2445 = vmatpush1.bf16.msra.mxu1 %v2444_v6  ;;  %2645 = vmatpush3.bf16.msra.mxu0 %v2644_v7  ;;  %v2660_v6 = vpack.c.bf16 %v627_v61, %v624_v60  ;;  %v808_v7 = vld [vmem:[#allocation8 + $0x720] sm:$0xff]  ;;  %v750_v61 = vld [vmem:[#allocation8 + $0x550] sm:$0xff] }
 0x17f   :  { %v3291_v30 = vpop.eup %2883  ;;  %2447 = vmatprep.subr.bf16.mxu1 %v2446_v15  ;;  %2647 = vmatprep.subr.bf16.mxu0 %v2646_v16  ;;  %v811_v15 = vld [vmem:[#allocation8 + $0x738] sm:$0xff]  ;;  %v678_v16 = vld [vmem:[#allocation8 + $0x310] sm:$0xff]  ;;  %v836_v60 = vld [vmem:[#allocation8 + $0x800] sm:$0xff] }
 0x180   :  { %1283 = vmatprep.mubr.f32.mxu1 %v3291_v30  ;;  %v2464_v24 = vpack.c.bf16 %v811_v15, %v808_v7  ;;  %v2678_v7 = vpack.c.bf16 %v753_v62, %v750_v61  ;;  %v839_v15 = vld [vmem:[#allocation8 + $0x818] sm:$0xff]  ;;  %v860_v61 = vld [vmem:[#allocation8 + $0x8c0] sm:$0xff]  ;;  %v822_v62 = vld [vmem:[#allocation8 + $0x790] sm:$0xff] }
 0x182   :  { %2449 = vmatpush1.bf16.msra.mxu1 %v2448_v25  ;;  %2649 = vmatpush3.bf16.msra.mxu0 %v2648_v26  ;;  %v2664_v25 = vpack.c.bf16 %v681_v17, %v678_v16  ;;  %v814_v26 = vld [vmem:[#allocation8 + $0x750] sm:$0xff]  ;;  %v756_v17 = vld [vmem:[#allocation8 + $0x580] sm:$0xff] }
 0x183   :  { %2451 = vmatprep.subr.bf16.mxu1 %v2450_v31  ;;  %2651 = vmatprep.subr.bf16.mxu0 %v2650_v32  ;;  %v684_v31 = vld [vmem:[#allocation8 + $0x340] sm:$0xff]  ;;  %v687_v32 = vld [vmem:[#allocation8 + $0x358] sm:$0xff]  ;;  %v2468_v40 = vpack.c.bf16 %v817_v27, %v814_v26  ;;  %v842_v16 = vld [vmem:[#allocation8 + $0x830] sm:$0xff]  ;;  %v2682_v26 = vpack.c.bf16 %v759_v19, %v756_v17 }
 0x184   :  { %v708_v27 = vld [vmem:[#allocation8 + $0x400] sm:$0xff]  ;;  %v863_v17 = vld [vmem:[#allocation8 + $0x8d8] sm:$0xff] }
 0x185   :  { %v828_v19 = vld [vmem:[#allocation8 + $0x7c0] sm:$0xff] }
 0x186   :  { %2453 = vmatpush1.bf16.msra.mxu1 %v2452_v41  ;;  %2653 = vmatpush3.bf16.msra.mxu0 %v2652_v43  ;;  %v2668_v41 = vpack.c.bf16 %v687_v32, %v684_v31  ;;  %v820_v43 = vld [vmem:[#allocation8 + $0x780] sm:$0xff]  ;;  %v845_v31 = vld [vmem:[#allocation8 + $0x848] sm:$0xff]  ;;  %v179_v32 = vsub.s32 4, %v3252_v9 }
 0x187   :  { %2455 = vmatprep.subr.bf16.mxu1 %v2454_v46  ;;  %2655 = vmatprep.subr.bf16.mxu0 %v2654_v47  ;;  %v2670_v46 = vpack.c.bf16 %v741_v39, %v738_v38  ;;  %v690_v47 = vld [vmem:[#allocation8 + $0x370] sm:$0xff] }
 0x188   :  { %v2672_v53 = vpack.c.bf16 %v693_v48, %v690_v47  ;;  %v851_v47 = vld [vmem:[#allocation8 + $0x878] sm:$0xff]  ;;  %v180_v48 = vrot.slane %v3257_v11, %v179_v32 }
 0x189   :  { %v783_v32 = vld [vmem:[#allocation8 + $0x658] sm:$0xff] }
 0x18a   :  { %2457 = vmatpush1.bf16.msra.mxu1 %v2456_v54  ;;  %2657 = vmatpush3.bf16.msra.mxu0 %v2656_v55  ;;  %v826_v54 = vld [vmem:[#allocation8 + $0x7b0] sm:$0xff]  ;;  %v829_v55 = vld [vmem:[#allocation8 + $0x7c8] sm:$0xff] }
 0x18b   :  { %2459 = vmatprep.subr.bf16.mxu1 %v2458_v57  ;;  %2659 = vmatprep.subr.bf16.mxu0 %v2658_v59  ;;  %v699_v57 = vld [vmem:[#allocation8 + $0x3b8] sm:$0xff]  ;;  %v833_v59 = vld [vmem:[#allocation8 + $0x7e8] sm:$0xff]  ;;  %v2476_v63 = vpack.c.bf16 %v829_v55, %v826_v54  ;;  %v850_v54 = vld [vmem:[#allocation8 + $0x870] sm:$0xff] }
 0x18c   :  { %v2676_v2 = vpack.c.bf16 %v699_v57, %v696_v20  ;;  %v853_v55 = vld [vmem:[#allocation8 + $0x888] sm:$0xff]  ;;  %v720_v20 = vld [vmem:[#allocation8 + $0x460] sm:$0xff]  ;;  %v723_v57 = vld [vmem:[#allocation8 + $0x478] sm:$0xff] }
 0x18e   :  { %2461 = vmatpush1.bf16.msra.mxu1 %v2460_v4  ;;  %2661 = vmatpush3.bf16.msra.mxu0 %v2660_v6  ;;  %v835_v4 = vld [vmem:[#allocation8 + $0x7f8] sm:$0xff]  ;;  %v2478_v6 = vpack.c.bf16 %v836_v60, %v833_v59  ;;  %v857_v59 = vld [vmem:[#allocation8 + $0x8a8] sm:$0xff]  ;;  %v424_v60 = vadd.f32 %v3277_v42, %v180_v48  ;;  %v866_v42 = vld [vmem:[#allocation8 + $0x8f0] sm:$0xff] }
 0x18f   :  { %2463 = vmatprep.subr.bf16.mxu1 %v2462_v8  ;;  %2663 = vmatprep.subr.bf16.mxu0 %v2662_v13  ;;  %v702_v8 = vld [vmem:[#allocation8 + $0x3d0] sm:$0xff]  ;;  %v705_v13 = vld [vmem:[#allocation8 + $0x3e8] sm:$0xff]  ;;  %v2480_v21 = vpack.c.bf16 %v835_v4, %v832_v3  ;;  %v2492_v3 = vpack.c.bf16 %v853_v55, %v850_v54  ;;  %v2692_v4 = vpack.c.bf16 %v723_v57, %v720_v20  ;;  %v884_v57 = vld [vmem:[#allocation8 + $0x980] sm:$0xff] }
 0x190   :  { %v2680_v22 = vpack.c.bf16 %v705_v13, %v702_v8  ;;  %v2494_v8 = vpack.c.bf16 %v860_v61, %v857_v59  ;;  %2885 = vtanh.f32 %v424_v60  ;;  %v878_v48 = vld [vmem:[#allocation8 + $0x950] sm:$0xff]  ;;  %v881_v20 = vld [vmem:[#allocation8 + $0x968] sm:$0xff] }
 0x191   :  { %1497 = vmatmul.mubr.f32.vlgmr.msra.gmra.mrb[4].mxu0 %v3273_v33  ;;  %v2472_v33 = vpack.c.bf16 %v823_v44, %v820_v43  ;;  %v2486_v43 = vpack.c.bf16 %v848_v34, %v845_v31  ;;  %v780_v31 = vld [vmem:[#allocation8 + $0x640] sm:$0xff]  ;;  %v869_v34 = vld [vmem:[#allocation8 + $0x908] sm:$0xff] }
 0x192   :  { %2465 = vmatpush1.bf16.msra.mxu1 %v2464_v24  ;;  %2665 = vmatpush3.bf16.msra.mxu0 %v2664_v25  ;;  %v841_v24 = vld [vmem:[#allocation8 + $0x828] sm:$0xff]  ;;  %v2482_v25 = vpack.c.bf16 %v842_v16, %v839_v15  ;;  %v774_v15 = vld [vmem:[#allocation8 + $0x610] sm:$0xff] }
 0x193   :  { %1566 = vmatprep.mubr.f32.mxu0 %v3279_v58  ;;  %2467 = vmatprep.subr.bf16.mxu1 %v2466_v28  ;;  %v2674_v58 = vpack.c.bf16 %v747_v52, %v744_v51  ;;  %v711_v28 = vld [vmem:[#allocation8 + $0x418] sm:$0xff]  ;;  %v2484_v38 = vpack.c.bf16 %v841_v24, %v838_v23  ;;  %v191_v52 = vsub.s32 7, %v3252_v9  ;;  %v777_v16 = vld [vmem:[#allocation8 + $0x628] sm:$0xff] }
 0x194   :  { %2667 = vmatprep.subr.bf16.mxu0 %v2666_v35  ;;  %v762_v35 = vld [vmem:[#allocation8 + $0x5b0] sm:$0xff]  ;;  %v2684_v39 = vpack.c.bf16 %v711_v28, %v708_v27  ;;  %v771_v51 = vld [vmem:[#allocation8 + $0x5f8] sm:$0xff]  ;;  %v2696_v24 = vpack.c.bf16 %v777_v16, %v774_v15  ;;  %v2498_v27 = vpack.c.bf16 %v866_v42, %v863_v17  ;;  %v849_v59 = vld [vmem:[#allocation8 + $0x868] sm:$0xff] }
 0x195   :  { %v2686_v44 = vpack.c.bf16 %v765_v36, %v762_v35  ;;  %v872_v35 = vld [vmem:[#allocation8 + $0x920] sm:$0xff]  ;;  %v834_v36 = vld [vmem:[#allocation8 + $0x7f0] sm:$0xff]  ;;  %v855_v16 = vld [vmem:[#allocation8 + $0x898] sm:$0xff] }
 0x196   :  { %2469 = vmatpush1.bf16.msra.mxu1 %v2468_v40  ;;  %2669 = vmatpush3.bf16.msra.mxu0 %v2668_v41  ;;  %v844_v40 = vld [vmem:[#allocation8 + $0x840] sm:$0xff]  ;;  %v847_v41 = vld [vmem:[#allocation8 + $0x858] sm:$0xff] }
 0x197   :  { %2471 = vmatprep.subr.bf16.mxu1 %v2470_v45  ;;  %2671 = vmatprep.subr.bf16.mxu0 %v2670_v46  ;;  %v714_v45 = vld [vmem:[#allocation8 + $0x430] sm:$0xff]  ;;  %v717_v46 = vld [vmem:[#allocation8 + $0x448] sm:$0xff]  ;;  %v852_v15 = vld [vmem:[#allocation8 + $0x880] sm:$0xff] }
 0x19a   :  { %2473 = vmatpush1.bf16.msra.mxu1 %v2472_v33  ;;  %2673 = vmatpush3.bf16.msra.mxu0 %v2672_v53  ;;  %v2488_v33 = vpack.c.bf16 %v847_v41, %v844_v40  ;;  %v2688_v53 = vpack.c.bf16 %v717_v46, %v714_v45  ;;  %v868_v40 = vld [vmem:[#allocation8 + $0x900] sm:$0xff]  ;;  %v871_v41 = vld [vmem:[#allocation8 + $0x918] sm:$0xff]  ;;  %v786_v45 = vld [vmem:[#allocation8 + $0x670] sm:$0xff] }
 0x19b   :  { %2475 = vmatprep.subr.bf16.mxu1 %v2474_v56  ;;  %2675 = vmatprep.subr.bf16.mxu0 %v2674_v58  ;;  %v2490_v56 = vpack.c.bf16 %v854_v49, %v851_v47  ;;  %v2690_v58 = vpack.c.bf16 %v771_v51, %v768_v50  ;;  %v789_v46 = vld [vmem:[#allocation8 + $0x688] sm:$0xff]  ;;  %v875_v47 = vld [vmem:[#allocation8 + $0x938] sm:$0xff]  ;;  %v840_v49 = vld [vmem:[#allocation8 + $0x820] sm:$0xff]  ;;  %v2504_v51 = vpack.c.bf16 %v871_v41, %v868_v40 }
 0x19c   :  { %v843_v50 = vld [vmem:[#allocation8 + $0x838] sm:$0xff]  ;;  %v2506_v54 = vpack.c.bf16 %v878_v48, %v875_v47  ;;  %v813_v40 = vld [vmem:[#allocation8 + $0x748] sm:$0xff]  ;;  %v898_v48 = vld [vmem:[#allocation8 + $0x9f0] sm:$0xff] }
 0x19d   :  { %v2706_v55 = vpack.c.bf16 %v843_v50, %v840_v49  ;;  %v899_v41 = vld [vmem:[#allocation8 + $0x9f8] sm:$0xff]  ;;  %v901_v49 = vld [vmem:[#allocation8 + $0xa08] sm:$0xff] }
 0x19e   :  { %2477 = vmatpush1.bf16.msra.mxu1 %v2476_v63  ;;  %2677 = vmatpush3.bf16.msra.mxu0 %v2676_v2  ;;  %v825_v63 = vld [vmem:[#allocation8 + $0x7a8] sm:$0xff]  ;;  %v192_v2 = vrot.slane %v3257_v11, %v191_v52  ;;  %v2704_v52 = vpack.c.bf16 %v789_v46, %v786_v45  ;;  %v867_v45 = vld [vmem:[#allocation8 + $0x8f8] sm:$0xff] }
 0x19f   :  { %2479 = vmatprep.subr.bf16.mxu1 %v2478_v6  ;;  %2679 = vmatprep.subr.bf16.mxu0 %v2678_v7  ;;  %v856_v6 = vld [vmem:[#allocation8 + $0x8a0] sm:$0xff]  ;;  %v859_v7 = vld [vmem:[#allocation8 + $0x8b8] sm:$0xff]  ;;  %v2694_v13 = vpack.c.bf16 %v825_v63, %v822_v62 }
 0x1a0   :  { %v2496_v23 = vpack.c.bf16 %v859_v7, %v856_v6  ;;  %v880_v62 = vld [vmem:[#allocation8 + $0x960] sm:$0xff]  ;;  %v883_v63 = vld [vmem:[#allocation8 + $0x978] sm:$0xff]  ;;  %v798_v6 = vld [vmem:[#allocation8 + $0x6d0] sm:$0xff] }
 0x1a1   :  { %v801_v7 = vld [vmem:[#allocation8 + $0x6e8] sm:$0xff]  ;;  %v2512_v17 = vpack.c.bf16 %v883_v63, %v880_v62  ;;  %v911_v63 = vld [vmem:[#allocation8 + $0xa58] sm:$0xff] }
 0x1a2   :  { %2481 = vmatpush1.bf16.msra.mxu1 %v2480_v21  ;;  %2681 = vmatpush3.bf16.msra.mxu0 %v2680_v22  ;;  %v831_v21 = vld [vmem:[#allocation8 + $0x7d8] sm:$0xff]  ;;  %v497_v22 = vadd.f32 %v3287_v14, %v192_v2  ;;  %v2712_v42 = vpack.c.bf16 %v801_v7, %v798_v6  ;;  %v873_v62 = vld [vmem:[#allocation8 + $0x928] sm:$0xff] }
 0x1a3   :  { %2483 = vmatprep.subr.bf16.mxu1 %v2482_v25  ;;  %2683 = vmatprep.subr.bf16.mxu0 %v2682_v26  ;;  %v862_v25 = vld [vmem:[#allocation8 + $0x8d0] sm:$0xff]  ;;  %v865_v26 = vld [vmem:[#allocation8 + $0x8e8] sm:$0xff]  ;;  %v2698_v28 = vpack.c.bf16 %v831_v21, %v828_v19  ;;  %v927_v6 = vld [vmem:[#allocation8 + $0xad8] sm:$0xff] }
 0x1a4   :  { %2887 = vtanh.f32 %v497_v22  ;;  %v2500_v14 = vpack.c.bf16 %v865_v26, %v862_v25  ;;  %v886_v19 = vld [vmem:[#allocation8 + $0x990] sm:$0xff]  ;;  %v889_v21 = vld [vmem:[#allocation8 + $0x9a8] sm:$0xff]  ;;  %v807_v25 = vld [vmem:[#allocation8 + $0x718] sm:$0xff] }
 0x1a5   :  { %v893_v26 = vld [vmem:[#allocation8 + $0x9c8] sm:$0xff] }
 0x1a6   :  { %2485 = vmatpush1.bf16.msra.mxu1 %v2484_v38  ;;  %2685 = vmatpush3.bf16.msra.mxu0 %v2684_v39  ;;  %v837_v38 = vld [vmem:[#allocation8 + $0x808] sm:$0xff]  ;;  %v2700_v39 = vpack.c.bf16 %v783_v32, %v780_v31  ;;  %v2516_v32 = vpack.c.bf16 %v889_v21, %v886_v19  ;;  %v879_v19 = vld [vmem:[#allocation8 + $0x958] sm:$0xff] }
 0x1a7   :  { %2487 = vmatprep.subr.bf16.mxu1 %v2486_v43  ;;  %2687 = vmatprep.subr.bf16.mxu0 %v2686_v44  ;;  %v2502_v43 = vpack.c.bf16 %v872_v35, %v869_v34  ;;  %v2702_v44 = vpack.c.bf16 %v837_v38, %v834_v36  ;;  %v861_v31 = vld [vmem:[#allocation8 + $0x8c8] sm:$0xff]  ;;  %v892_v35 = vld [vmem:[#allocation8 + $0x9c0] sm:$0xff]  ;;  %v895_v36 = vld [vmem:[#allocation8 + $0x9d8] sm:$0xff] }
 0x1a8   :  { %v2520_v46 = vpack.c.bf16 %v895_v36, %v892_v35  ;;  %v917_v21 = vld [vmem:[#allocation8 + $0xa88] sm:$0xff]  ;;  %v923_v36 = vld [vmem:[#allocation8 + $0xab8] sm:$0xff] }
 0x1a9   :  { %v885_v35 = vld [vmem:[#allocation8 + $0x988] sm:$0xff] }
 0x1aa   :  { %2489 = vmatpush1.bf16.msra.mxu1 %v2488_v33  ;;  %2689 = vmatpush3.bf16.msra.mxu0 %v2688_v53  ;;  %v874_v33 = vld [vmem:[#allocation8 + $0x930] sm:$0xff]  ;;  %v877_v53 = vld [vmem:[#allocation8 + $0x948] sm:$0xff] }
 0x1ab   :  { %2491 = vmatprep.subr.bf16.mxu1 %v2490_v56  ;;  %2691 = vmatprep.subr.bf16.mxu0 %v2690_v58  ;;  %v792_v56 = vld [vmem:[#allocation8 + $0x6a0] sm:$0xff]  ;;  %v795_v58 = vld [vmem:[#allocation8 + $0x6b8] sm:$0xff]  ;;  %v2508_v60 = vpack.c.bf16 %v877_v53, %v874_v33  ;;  %v905_v53 = vld [vmem:[#allocation8 + $0xa28] sm:$0xff] }
 0x1ac   :  { %v2708_v61 = vpack.c.bf16 %v795_v58, %v792_v56  ;;  %v819_v33 = vld [vmem:[#allocation8 + $0x778] sm:$0xff]  ;;  %v921_v56 = vld [vmem:[#allocation8 + $0xaa8] sm:$0xff]  ;;  %v2524_v58 = vpack.c.bf16 %v901_v49, %v898_v48  ;;  %v187_v49 = vsub.s32 6, %v3252_v9 }
 0x1ad   :  { %v929_v48 = vld [vmem:[#allocation8 + $0xae8] sm:$0xff] }
 0x1ae   :  { %2493 = vmatpush1.bf16.msra.mxu1 %v2492_v3  ;;  %2693 = vmatpush3.bf16.msra.mxu0 %v2692_v4  ;;  %v2510_v3 = vpack.c.bf16 %v884_v57, %v881_v20  ;;  %v904_v57 = vld [vmem:[#allocation8 + $0xa20] sm:$0xff] }
 0x1af   :  { %2495 = vmatprep.subr.bf16.mxu1 %v2494_v8  ;;  %2695 = vmatprep.subr.bf16.mxu0 %v2694_v13  ;;  %v887_v8 = vld [vmem:[#allocation8 + $0x998] sm:$0xff]  ;;  %v890_v13 = vld [vmem:[#allocation8 + $0x9b0] sm:$0xff]  ;;  %v1797_v9 = vld [vmem:[#allocation11 + $0x60] sm:$0xff] }
 0x1b0   :  { %v2514_v22 = vpack.c.bf16 %v890_v13, %v887_v8  ;;  %v910_v13 = vld [vmem:[#allocation8 + $0xa50] sm:$0xff] }
 0x1b1   :  { %1567 = vmatmul.mubr.f32.vlgmr.msra.gmra.mrb[6].mxu0 %v3281_v1  ;;  %v3306_v1 = vpop.eup %2885 }
 0x1b2   :  { %2497 = vmatpush1.bf16.msra.mxu1 %v2496_v23  ;;  %2697 = vmatpush3.bf16.msra.mxu0 %v2696_v24  ;;  %v3309_v2 = vpop.eup %2887  ;;  %v2714_v23 = vpack.c.bf16 %v855_v16, %v852_v15  ;;  %v804_v24 = vld [vmem:[#allocation8 + $0x700] sm:$0xff]  ;;  %v913_v15 = vld [vmem:[#allocation8 + $0xa68] sm:$0xff] }
 0x1b3   :  { %2499 = vmatprep.subr.bf16.mxu1 %v2498_v27  ;;  %2699 = vmatprep.subr.bf16.mxu0 %v2698_v28  ;;  %v896_v27 = vld [vmem:[#allocation8 + $0x9e0] sm:$0xff]  ;;  %v858_v28 = vld [vmem:[#allocation8 + $0x8b0] sm:$0xff]  ;;  %v2716_v34 = vpack.c.bf16 %v807_v25, %v804_v24  ;;  %v933_v24 = vld [vmem:[#allocation8 + $0xb08] sm:$0xff]  ;;  %v2532_v25 = vpack.c.bf16 %v913_v15, %v910_v13 }
 0x1b4   :  { %1636 = vmatprep.mubr.f32.mxu0 %v3291_v30  ;;  %v846_v30 = vld [vmem:[#allocation8 + $0x850] sm:$0xff]  ;;  %v2518_v38 = vpack.c.bf16 %v896_v27, %v893_v26  ;;  %v916_v27 = vld [vmem:[#allocation8 + $0xa80] sm:$0xff]  ;;  %v903_v15 = vld [vmem:[#allocation8 + $0xa18] sm:$0xff] }
 0x1b5   :  { %v2710_v4 = vpack.c.bf16 %v849_v59, %v846_v30  ;;  %v907_v30 = vld [vmem:[#allocation8 + $0xa38] sm:$0xff]  ;;  %v900_v13 = vld [vmem:[#allocation8 + $0xa00] sm:$0xff] }
 0x1b6   :  { %2501 = vmatpush1.bf16.msra.mxu1 %v2500_v14  ;;  %2701 = vmatpush3.bf16.msra.mxu0 %v2700_v39  ;;  %v2718_v14 = vpack.c.bf16 %v861_v31, %v858_v28  ;;  %v810_v39 = vld [vmem:[#allocation8 + $0x730] sm:$0xff]  ;;  %v2528_v7 = vpack.c.bf16 %v907_v30, %v904_v57  ;;  %v919_v28 = vld [vmem:[#allocation8 + $0xa98] sm:$0xff] }
 0x1b7   :  { %2503 = vmatprep.subr.bf16.mxu1 %v2502_v43  ;;  %2703 = vmatprep.subr.bf16.mxu0 %v2702_v44  ;;  %v902_v43 = vld [vmem:[#allocation8 + $0xa10] sm:$0xff]  ;;  %v864_v44 = vld [vmem:[#allocation8 + $0x8e0] sm:$0xff]  ;;  %v2720_v47 = vpack.c.bf16 %v813_v40, %v810_v39  ;;  %v939_v39 = vld [vmem:[#allocation8 + $0xb38] sm:$0xff] }
 0x1b8   :  { %v2522_v50 = vpack.c.bf16 %v902_v43, %v899_v41  ;;  %v922_v41 = vld [vmem:[#allocation8 + $0xab0] sm:$0xff]  ;;  %v925_v43 = vld [vmem:[#allocation8 + $0xac8] sm:$0xff]  ;;  %v935_v57 = vld [vmem:[#allocation8 + $0xb18] sm:$0xff] }
 0x1b9   :  { %1284 = vmatmul.mubr.f32.vlgmr.msra.gmra.mrb[8].mxu1 %v3306_v1  ;;  %v938_v30 = vld [vmem:[#allocation8 + $0xb30] sm:$0xff] }
 0x1ba   :  { %2505 = vmatpush1.bf16.msra.mxu1 %v2504_v51  ;;  %2705 = vmatpush3.bf16.msra.mxu0 %v2704_v52  ;;  %v2722_v51 = vpack.c.bf16 %v867_v45, %v864_v44  ;;  %v816_v52 = vld [vmem:[#allocation8 + $0x760] sm:$0xff] }
 0x1bb   :  { %2507 = vmatprep.subr.bf16.mxu1 %v2506_v54  ;;  %2707 = vmatprep.subr.bf16.mxu0 %v2706_v55  ;;  %v908_v54 = vld [vmem:[#allocation8 + $0xa40] sm:$0xff]  ;;  %v918_v55 = vld [vmem:[#allocation8 + $0xa90] sm:$0xff]  ;;  %v2724_v20 = vpack.c.bf16 %v819_v33, %v816_v52  ;;  %v945_v52 = vld [vmem:[#allocation8 + $0xb68] sm:$0xff] }
 0x1bc   :  { %1354 = vmatprep.mubr.f32.mxu1 %v3309_v2  ;;  %v2526_v59 = vpack.c.bf16 %v908_v54, %v905_v53  ;;  %v928_v53 = vld [vmem:[#allocation8 + $0xae0] sm:$0xff]  ;;  %v931_v54 = vld [vmem:[#allocation8 + $0xaf8] sm:$0xff] }
 0x1be   :  { %2509 = vmatpush1.bf16.msra.mxu1 %v2508_v60  ;;  %2709 = vmatpush3.bf16.msra.mxu0 %v2708_v61  ;;  %v2726_v60 = vpack.c.bf16 %v921_v56, %v918_v55  ;;  %v870_v61 = vld [vmem:[#allocation8 + $0x910] sm:$0xff] }
 0x1bf   :  { %2511 = vmatprep.subr.bf16.mxu1 %v2510_v3  ;;  %2711 = vmatprep.subr.bf16.mxu0 %v2710_v4  ;;  %v914_v3 = vld [vmem:[#allocation8 + $0xa70] sm:$0xff]  ;;  %v924_v4 = vld [vmem:[#allocation8 + $0xac0] sm:$0xff]  ;;  %v2728_v8 = vpack.c.bf16 %v873_v62, %v870_v61  ;;  %v951_v61 = vld [vmem:[#allocation8 + $0xb98] sm:$0xff] }
 0x1c0   :  { %v2530_v16 = vpack.c.bf16 %v914_v3, %v911_v63  ;;  %v894_v55 = vld [vmem:[#allocation8 + $0x9d0] sm:$0xff]  ;;  %v3316_v62 = vld [vmem:[#allocation7 + $0x8] sm:$0x3]  ;;  %v2544_v63 = vpack.c.bf16 %v931_v54, %v928_v53  ;;  %v969_v53 = vld [vmem:[#allocation8 + $0xc28] sm:$0xff] }
 0x1c1   :  { %v959_v54 = vld [vmem:[#allocation8 + $0xbd8] sm:$0xff] }
 0x1c2   :  { %2513 = vmatpush1.bf16.msra.mxu1 %v2512_v17  ;;  %2713 = vmatpush3.bf16.msra.mxu0 %v2712_v42  ;;  %v2730_v17 = vpack.c.bf16 %v927_v6, %v924_v4  ;;  %v876_v42 = vld [vmem:[#allocation8 + $0x940] sm:$0xff]  ;;  %v934_v4 = vld [vmem:[#allocation8 + $0xb10] sm:$0xff]  ;;  %v937_v6 = vld [vmem:[#allocation8 + $0xb28] sm:$0xff] }
 0x1c3   :  { %2515 = vmatprep.subr.bf16.mxu1 %v2514_v22  ;;  %2715 = vmatprep.subr.bf16.mxu0 %v2714_v23  ;;  %v920_v22 = vld [vmem:[#allocation8 + $0xaa0] sm:$0xff]  ;;  %v930_v23 = vld [vmem:[#allocation8 + $0xaf0] sm:$0xff]  ;;  %v2732_v26 = vpack.c.bf16 %v879_v19, %v876_v42 }
 0x1c4   :  { %v2534_v31 = vpack.c.bf16 %v920_v22, %v917_v21  ;;  %v944_v42 = vld [vmem:[#allocation8 + $0xb60] sm:$0xff]  ;;  %v954_v19 = vld [vmem:[#allocation8 + $0xbb0] sm:$0xff]  ;;  %v957_v21 = vld [vmem:[#allocation8 + $0xbc8] sm:$0xff]  ;;  %v2548_v22 = vpack.c.bf16 %v937_v6, %v934_v4 }
 0x1c5   :  { %v975_v4 = vld [vmem:[#allocation8 + $0xc58] sm:$0xff]  ;;  %v965_v6 = vld [vmem:[#allocation8 + $0xc08] sm:$0xff] }
 0x1c6   :  { %2517 = vmatpush1.bf16.msra.mxu1 %v2516_v32  ;;  %2717 = vmatpush3.bf16.msra.mxu0 %v2716_v34  ;;  %v2734_v32 = vpack.c.bf16 %v933_v24, %v930_v23  ;;  %v882_v34 = vld [vmem:[#allocation8 + $0x970] sm:$0xff]  ;;  %v2748_v23 = vpack.c.bf16 %v903_v15, %v900_v13  ;;  %v940_v24 = vld [vmem:[#allocation8 + $0xb40] sm:$0xff]  ;;  %v1029_v13 = vld [vmem:[#allocation8 + $0xe08] sm:$0xff] }
 0x1c7   :  { %2519 = vmatprep.subr.bf16.mxu1 %v2518_v38  ;;  %2719 = vmatprep.subr.bf16.mxu0 %v2718_v14  ;;  %v926_v38 = vld [vmem:[#allocation8 + $0xad0] sm:$0xff]  ;;  %v936_v14 = vld [vmem:[#allocation8 + $0xb20] sm:$0xff]  ;;  %v2736_v40 = vpack.c.bf16 %v885_v35, %v882_v34 }
 0x1c8   :  { %v2538_v44 = vpack.c.bf16 %v926_v38, %v923_v36  ;;  %v2738_v45 = vpack.c.bf16 %v939_v39, %v936_v14  ;;  %v960_v35 = vld [vmem:[#allocation8 + $0xbe0] sm:$0xff]  ;;  %v963_v36 = vld [vmem:[#allocation8 + $0xbf8] sm:$0xff]  ;;  %v946_v39 = vld [vmem:[#allocation8 + $0xb70] sm:$0xff] }
 0x1ca   :  { %2521 = vmatpush1.bf16.msra.mxu1 %v2520_v46  ;;  %2721 = vmatpush3.bf16.msra.mxu0 %v2720_v47  ;;  %v888_v46 = vld [vmem:[#allocation8 + $0x9a0] sm:$0xff]  ;;  %v891_v47 = vld [vmem:[#allocation8 + $0x9b8] sm:$0xff] }
 0x1cb   :  { %2523 = vmatprep.subr.bf16.mxu1 %v2522_v50  ;;  %2723 = vmatprep.subr.bf16.mxu0 %v2722_v51  ;;  %v932_v50 = vld [vmem:[#allocation8 + $0xb00] sm:$0xff]  ;;  %v942_v51 = vld [vmem:[#allocation8 + $0xb50] sm:$0xff]  ;;  %v2740_v33 = vpack.c.bf16 %v891_v47, %v888_v46  ;;  %v1017_v47 = vld [vmem:[#allocation8 + $0xda8] sm:$0xff] }
 0x1cc   :  { %v2542_v56 = vpack.c.bf16 %v932_v50, %v929_v48  ;;  %v956_v46 = vld [vmem:[#allocation8 + $0xbc0] sm:$0xff] }
 0x1cd   :  { %v952_v50 = vld [vmem:[#allocation8 + $0xba0] sm:$0xff] }
 0x1ce   :  { %2525 = vmatpush1.bf16.msra.mxu1 %v2524_v58  ;;  %2725 = vmatpush3.bf16.msra.mxu0 %v2724_v20  ;;  %v2742_v58 = vpack.c.bf16 %v945_v52, %v942_v51  ;;  %v897_v20 = vld [vmem:[#allocation8 + $0x9e8] sm:$0xff]  ;;  %v955_v51 = vld [vmem:[#allocation8 + $0xbb8] sm:$0xff] }
 0x1cf   :  { %2527 = vmatprep.subr.bf16.mxu1 %v2526_v59  ;;  %2727 = vmatprep.subr.bf16.mxu0 %v2726_v60  ;;  %v188_v59 = vrot.slane %v3257_v11, %v187_v49  ;;  %v948_v60 = vld [vmem:[#allocation8 + $0xb80] sm:$0xff]  ;;  %v2744_v3 = vpack.c.bf16 %v897_v20, %v894_v55  ;;  %v200_v11 = vrot.slane %v3316_v62, %v3260_v12  ;;  %v962_v55 = vld [vmem:[#allocation8 + $0xbf0] sm:$0xff] }
 0x1d1   :  { %1637 = vmatmul.mubr.f32.vlgmr.msra.gmra.mrb[8].mxu0 %v3306_v1  ;;  %v2536_v1 = vpack.c.bf16 %v919_v28, %v916_v27  ;;  %v2750_v27 = vpack.c.bf16 %v957_v21, %v954_v19  ;;  %v906_v28 = vld [vmem:[#allocation8 + $0xa30] sm:$0xff]  ;;  %v568_v34 = vadd.f32 %v3293_v37, %v200_v11 }
 0x1d2   :  { %2529 = vmatpush1.bf16.msra.mxu1 %v2528_v7  ;;  %2729 = vmatpush3.bf16.msra.mxu0 %v2728_v8  ;;  %v2546_v7 = vpack.c.bf16 %v938_v30, %v935_v57  ;;  %v2746_v8 = vpack.c.bf16 %v951_v61, %v948_v60  ;;  %v1014_v37 = vld [vmem:[#allocation8 + $0xd90] sm:$0xff]  ;;  %v2560_v57 = vpack.c.bf16 %v955_v51, %v952_v50  ;;  %v961_v60 = vld [vmem:[#allocation8 + $0xbe8] sm:$0xff] }
 0x1d3   :  { %2531 = vmatprep.subr.bf16.mxu1 %v2530_v16  ;;  %2731 = vmatprep.subr.bf16.mxu0 %v2730_v17  ;;  %v941_v16 = vld [vmem:[#allocation8 + $0xb48] sm:$0xff]  ;;  %v495_v17 = vadd.f32 %v3285_v5, %v188_v59  ;;  %v950_v5 = vld [vmem:[#allocation8 + $0xb90] sm:$0xff]  ;;  %v2562_v61 = vpack.c.bf16 %v962_v55, %v959_v54  ;;  %v196_v50 = vrot.slane %v3316_v62, %v3255_v10  ;;  %v992_v62 = vld [vmem:[#allocation8 + $0xce0] sm:$0xff] }
 0x1d4   :  { %1706 = vmatprep.mubr.f32.mxu0 %v3309_v2  ;;  %v2540_v2 = vpack.c.bf16 %v925_v43, %v922_v41  ;;  %v2754_v41 = vpack.c.bf16 %v963_v36, %v960_v35  ;;  %v912_v43 = vld [vmem:[#allocation8 + $0xa60] sm:$0xff]  ;;  %v958_v59 = vld [vmem:[#allocation8 + $0xbd0] sm:$0xff]  ;;  %v985_v55 = vld [vmem:[#allocation8 + $0xca8] sm:$0xff] }
 0x1d5   :  { %2889 = vtanh.f32 %v495_v17  ;;  %v964_v17 = vld [vmem:[#allocation8 + $0xc00] sm:$0xff]  ;;  %v986_v51 = vld [vmem:[#allocation8 + $0xcb0] sm:$0xff] }
 0x1d6   :  { %2533 = vmatpush1.bf16.msra.mxu1 %v2532_v25  ;;  %2733 = vmatpush3.bf16.msra.mxu0 %v2732_v26  ;;  %v943_v25 = vld [vmem:[#allocation8 + $0xb58] sm:$0xff]  ;;  %v2550_v26 = vpack.c.bf16 %v944_v42, %v941_v16  ;;  %2891 = vtanh.f32 %v568_v34  ;;  %v2564_v16 = vpack.c.bf16 %v961_v60, %v958_v59  ;;  %v973_v34 = vld [vmem:[#allocation8 + $0xc48] sm:$0xff]  ;;  %v984_v36 = vld [vmem:[#allocation8 + $0xca0] sm:$0xff]  ;;  %v566_v59 = vadd.f32 %v3289_v29, %v196_v50 }
 0x1d7   :  { %2535 = vmatprep.subr.bf16.mxu1 %v2534_v31  ;;  %2735 = vmatprep.subr.bf16.mxu0 %v2734_v32  ;;  %v909_v31 = vld [vmem:[#allocation8 + $0xa48] sm:$0xff]  ;;  %v947_v32 = vld [vmem:[#allocation8 + $0xb78] sm:$0xff]  ;;  %v2552_v38 = vpack.c.bf16 %v943_v25, %v940_v24  ;;  %v974_v25 = vld [vmem:[#allocation8 + $0xc50] sm:$0xff] }
 0x1d8   :  { %v2752_v14 = vpack.c.bf16 %v909_v31, %v906_v28  ;;  %v967_v42 = vld [vmem:[#allocation8 + $0xc18] sm:$0xff]  ;;  %v982_v54 = vld [vmem:[#allocation8 + $0xc90] sm:$0xff]  ;;  %2893 = vtanh.f32 %v566_v59 }
 0x1d9   :  { %v971_v24 = vld [vmem:[#allocation8 + $0xc38] sm:$0xff]  ;;  %v2568_v28 = vpack.c.bf16 %v967_v42, %v964_v17  ;;  %v1050_v60 = vld [vmem:[#allocation8 + $0xeb0] sm:$0xff]  ;;  %v1056_v17 = vld [vmem:[#allocation8 + $0xee0] sm:$0xff] }
 0x1da   :  { %2537 = vmatpush1.bf16.msra.mxu1 %v2536_v1  ;;  %2737 = vmatpush3.bf16.msra.mxu0 %v2736_v40  ;;  %v949_v1 = vld [vmem:[#allocation8 + $0xb88] sm:$0xff]  ;;  %v2554_v40 = vpack.c.bf16 %v950_v5, %v947_v32  ;;  %v970_v32 = vld [vmem:[#allocation8 + $0xc30] sm:$0xff]  ;;  %v2570_v5 = vpack.c.bf16 %v974_v25, %v971_v24  ;;  %v1059_v29 = vld [vmem:[#allocation8 + $0xef8] sm:$0xff] }
 0x1db   :  { %2539 = vmatprep.subr.bf16.mxu1 %v2538_v44  ;;  %2739 = vmatprep.subr.bf16.mxu0 %v2738_v45  ;;  %v915_v44 = vld [vmem:[#allocation8 + $0xa78] sm:$0xff]  ;;  %v953_v45 = vld [vmem:[#allocation8 + $0xba8] sm:$0xff]  ;;  %v2556_v48 = vpack.c.bf16 %v949_v1, %v946_v39  ;;  %v980_v39 = vld [vmem:[#allocation8 + $0xc80] sm:$0xff] }
 0x1dc   :  { %v2756_v49 = vpack.c.bf16 %v915_v44, %v912_v43  ;;  %v2558_v52 = vpack.c.bf16 %v956_v46, %v953_v45  ;;  %v1038_v1 = vld [vmem:[#allocation8 + $0xe50] sm:$0xff]  ;;  %v976_v44 = vld [vmem:[#allocation8 + $0xc60] sm:$0xff]  ;;  %v979_v45 = vld [vmem:[#allocation8 + $0xc78] sm:$0xff] }
 0x1dd   :  { %v997_v24 = vld [vmem:[#allocation8 + $0xd08] sm:$0xff]  ;;  %v1008_v25 = vld [vmem:[#allocation8 + $0xd60] sm:$0xff] }
 0x1de   :  { %2541 = vmatpush1.bf16.msra.mxu1 %v2540_v2  ;;  %2741 = vmatpush3.bf16.msra.mxu0 %v2740_v33  ;;  %v2758_v2 = vpack.c.bf16 %v1017_v47, %v1014_v37  ;;  %v966_v33 = vld [vmem:[#allocation8 + $0xc10] sm:$0xff] }
 0x1df   :  { %2543 = vmatprep.subr.bf16.mxu1 %v2542_v56  ;;  %2743 = vmatprep.subr.bf16.mxu0 %v2742_v58  ;;  %v1020_v56 = vld [vmem:[#allocation8 + $0xdc0] sm:$0xff]  ;;  %v1023_v58 = vld [vmem:[#allocation8 + $0xdd8] sm:$0xff]  ;;  %v2890_v20 = vpop.eup %2889  ;;  %v2760_v30 = vpack.c.bf16 %v969_v53, %v966_v33  ;;  %v990_v47 = vld [vmem:[#allocation8 + $0xcd0] sm:$0xff]  ;;  %v2576_v33 = vpack.c.bf16 %v979_v45, %v976_v44 }
 0x1e0   :  { %v2892_v15 = vpop.eup %2891  ;;  %v1016_v44 = vld [vmem:[#allocation8 + $0xda0] sm:$0xff] }
 0x1e2   :  { %2545 = vmatpush1.bf16.msra.mxu1 %v2544_v63  ;;  %2745 = vmatpush3.bf16.msra.mxu0 %v2744_v3  ;;  %v2762_v63 = vpack.c.bf16 %v1023_v58, %v1020_v56  ;;  %v972_v3 = vld [vmem:[#allocation8 + $0xc40] sm:$0xff] }
 0x1e3   :  { %2547 = vmatprep.subr.bf16.mxu1 %v2546_v7  ;;  %2747 = vmatprep.subr.bf16.mxu0 %v2746_v8  ;;  %v968_v7 = vld [vmem:[#allocation8 + $0xc20] sm:$0xff]  ;;  %v1026_v8 = vld [vmem:[#allocation8 + $0xdf0] sm:$0xff]  ;;  %v2764_v11 = vpack.c.bf16 %v975_v4, %v972_v3 }
 0x1e4   :  { %v2566_v19 = vpack.c.bf16 %v968_v7, %v965_v6  ;;  %v2766_v21 = vpack.c.bf16 %v1029_v13, %v1026_v8  ;;  %v988_v4 = vld [vmem:[#allocation8 + $0xcc0] sm:$0xff]  ;;  %v991_v6 = vld [vmem:[#allocation8 + $0xcd8] sm:$0xff]  ;;  %v1002_v13 = vld [vmem:[#allocation8 + $0xd30] sm:$0xff] }
 0x1e5   :  { %v2584_v42 = vpack.c.bf16 %v991_v6, %v988_v4  ;;  %v1036_v6 = vld [vmem:[#allocation8 + $0xe40] sm:$0xff] }
 0x1e6   :  { %2549 = vmatpush1.bf16.msra.mxu1 %v2548_v22  ;;  %2749 = vmatpush3.bf16.msra.mxu0 %v2748_v23  ;;  %v978_v22 = vld [vmem:[#allocation8 + $0xc70] sm:$0xff]  ;;  %v981_v23 = vld [vmem:[#allocation8 + $0xc88] sm:$0xff] }
 0x1e7   :  { %2551 = vmatprep.subr.bf16.mxu1 %v2550_v26  ;;  %2751 = vmatprep.subr.bf16.mxu0 %v2750_v27  ;;  %v1032_v26 = vld [vmem:[#allocation8 + $0xe20] sm:$0xff]  ;;  %v1035_v27 = vld [vmem:[#allocation8 + $0xe38] sm:$0xff]  ;;  %v2768_v31 = vpack.c.bf16 %v981_v23, %v978_v22  ;;  %v2786_v23 = vpack.c.bf16 %v1059_v29, %v1056_v17  ;;  %v1045_v17 = vld [vmem:[#allocation8 + $0xe88] sm:$0xff] }
 0x1e8   :  { %v2770_v35 = vpack.c.bf16 %v1035_v27, %v1032_v26  ;;  %v1011_v26 = vld [vmem:[#allocation8 + $0xd78] sm:$0xff]  ;;  %v1001_v27 = vld [vmem:[#allocation8 + $0xd28] sm:$0xff] }
 0x1e9   :  { %v1049_v29 = vld [vmem:[#allocation8 + $0xea8] sm:$0xff] }
 0x1ea   :  { %2553 = vmatpush1.bf16.msra.mxu1 %v2552_v38  ;;  %2753 = vmatpush3.bf16.msra.mxu0 %v2752_v14  ;;  %v987_v38 = vld [vmem:[#allocation8 + $0xcb8] sm:$0xff]  ;;  %v977_v14 = vld [vmem:[#allocation8 + $0xc68] sm:$0xff] }
 0x1eb   :  { %2555 = vmatprep.subr.bf16.mxu1 %v2554_v40  ;;  %2755 = vmatprep.subr.bf16.mxu0 %v2754_v41  ;;  %v1041_v40 = vld [vmem:[#allocation8 + $0xe68] sm:$0xff]  ;;  %v2572_v41 = vpack.c.bf16 %v973_v34, %v970_v32  ;;  %v2772_v43 = vpack.c.bf16 %v987_v38, %v984_v36  ;;  %v2574_v46 = vpack.c.bf16 %v980_v39, %v977_v14  ;;  %v1007_v36 = vld [vmem:[#allocation8 + $0xd58] sm:$0xff]  ;;  %v1010_v38 = vld [vmem:[#allocation8 + $0xd70] sm:$0xff]  ;;  %v3325_v14 = vpop.eup %2893 }
 0x1ec   :  { %v2774_v37 = vpack.c.bf16 %v1041_v40, %v1038_v1  ;;  %v2788_v32 = vpack.c.bf16 %v1011_v26, %v1008_v25  ;;  %v2594_v1 = vpack.c.bf16 %v1010_v38, %v1007_v36  ;;  %v1006_v40 = vld [vmem:[#allocation8 + $0xd50] sm:$0xff] }
 0x1ed   :  { %v1058_v25 = vld [vmem:[#allocation8 + $0xef0] sm:$0xff] }
 0x1ee   :  { %2557 = vmatpush1.bf16.msra.mxu1 %v2556_v48  ;;  %2757 = vmatpush3.bf16.msra.mxu0 %v2756_v49  ;;  %v993_v48 = vld [vmem:[#allocation8 + $0xce8] sm:$0xff]  ;;  %v983_v49 = vld [vmem:[#allocation8 + $0xc98] sm:$0xff] }
 0x1ef   :  { %2559 = vmatprep.subr.bf16.mxu1 %v2558_v52  ;;  %2759 = vmatprep.subr.bf16.mxu0 %v2758_v2  ;;  %v1044_v52 = vld [vmem:[#allocation8 + $0xe80] sm:$0xff]  ;;  %v1047_v2 = vld [vmem:[#allocation8 + $0xe98] sm:$0xff]  ;;  %v2776_v53 = vpack.c.bf16 %v993_v48, %v990_v47  ;;  %v2578_v56 = vpack.c.bf16 %v986_v51, %v983_v49  ;;  %v1022_v49 = vld [vmem:[#allocation8 + $0xdd0] sm:$0xff] }
 0x1f0   :  { %v2778_v58 = vpack.c.bf16 %v1047_v2, %v1044_v52  ;;  %v1015_v47 = vld [vmem:[#allocation8 + $0xd98] sm:$0xff]  ;;  %v1018_v52 = vld [vmem:[#allocation8 + $0xdb0] sm:$0xff]  ;;  %v1021_v2 = vld [vmem:[#allocation8 + $0xdc8] sm:$0xff] }
 0x1f1   :  { %1707 = vmatmul.mubr.f32.vlgmr.msra.gmra.mrb[10].mxu0 %v2890_v20  ;;  %v1019_v48 = vld [vmem:[#allocation8 + $0xdb8] sm:$0xff] }
 0x1f2   :  { %2561 = vmatpush1.bf16.msra.mxu1 %v2560_v57  ;;  %2761 = vmatpush3.bf16.msra.mxu0 %v2760_v30  ;;  %v999_v57 = vld [vmem:[#allocation8 + $0xd18] sm:$0xff]  ;;  %v989_v30 = vld [vmem:[#allocation8 + $0xcc8] sm:$0xff]  ;;  %v2602_v51 = vpack.c.bf16 %v1022_v49, %v1019_v48 }
 0x1f3   :  { %2563 = vmatprep.subr.bf16.mxu1 %v2562_v61  ;;  %2763 = vmatprep.subr.bf16.mxu0 %v2762_v63  ;;  %v1053_v61 = vld [vmem:[#allocation8 + $0xec8] sm:$0xff]  ;;  %v2580_v63 = vpack.c.bf16 %v985_v55, %v982_v54  ;;  %v2582_v7 = vpack.c.bf16 %v992_v62, %v989_v30  ;;  %v2604_v54 = vpack.c.bf16 %v1021_v2, %v1018_v52  ;;  %v1030_v62 = vld [vmem:[#allocation8 + $0xe10] sm:$0xff]  ;;  %v1788_v48 = vld [vmem:[#allocation11 + $0x18] sm:$0xff] }
 0x1f4   :  { %1776 = vmatprep.mubr.f32.mxu0 %v2892_v15  ;;  %v2782_v8 = vpack.c.bf16 %v1053_v61, %v1050_v60  ;;  %v1033_v60 = vld [vmem:[#allocation8 + $0xe28] sm:$0xff] }
 0x1f5   :  { %v1037_v61 = vld [vmem:[#allocation8 + $0xe48] sm:$0xff] }
 0x1f6   :  { %2565 = vmatpush1.bf16.msra.mxu1 %v2564_v16  ;;  %2765 = vmatpush3.bf16.msra.mxu0 %v2764_v11  ;;  %v995_v16 = vld [vmem:[#allocation8 + $0xcf8] sm:$0xff]  ;;  %v998_v11 = vld [vmem:[#allocation8 + $0xd10] sm:$0xff]  ;;  %v1805_v49 = vld [vmem:[#allocation11 + $0xa0] sm:$0xff] }
 0x1f7   :  { %2567 = vmatprep.subr.bf16.mxu1 %v2566_v19  ;;  %2767 = vmatprep.subr.bf16.mxu0 %v2766_v21  ;;  %v994_v21 = vld [vmem:[#allocation8 + $0xcf0] sm:$0xff]  ;;  %v2586_v22 = vpack.c.bf16 %v998_v11, %v995_v16  ;;  %v1789_v52 = vld [vmem:[#allocation11 + $0x20] sm:$0xff] }
 0x1f8   :  { %v1042_v11 = vld [vmem:[#allocation8 + $0xe70] sm:$0xff] }
 0x1f9   :  { %1355 = vmatmul.mubr.f32.vlgmr.msra.gmra.mrb[8].mxu1 %v2890_v20  ;;  %v996_v20 = vld [vmem:[#allocation8 + $0xd00] sm:$0xff]  ;;  %v1790_v2 = vld [vmem:[#allocation11 + $0x28] sm:$0xff] }
 0x1fa   :  { %2569 = vmatpush1.bf16.msra.mxu1 %v2568_v28  ;;  %2769 = vmatpush3.bf16.msra.mxu0 %v2768_v31  ;;  %v2780_v3 = vpack.c.bf16 %v999_v57, %v996_v20  ;;  %v1004_v28 = vld [vmem:[#allocation8 + $0xd40] sm:$0xff]  ;;  %v2588_v31 = vpack.c.bf16 %v997_v24, %v994_v21  ;;  %v1031_v20 = vld [vmem:[#allocation8 + $0xe18] sm:$0xff]  ;;  %v1034_v57 = vld [vmem:[#allocation8 + $0xe30] sm:$0xff] }
 0x1fb   :  { %2571 = vmatprep.subr.bf16.mxu1 %v2570_v5  ;;  %2771 = vmatprep.subr.bf16.mxu0 %v2770_v35  ;;  %v2590_v34 = vpack.c.bf16 %v1004_v28, %v1001_v27  ;;  %v1000_v5 = vld [vmem:[#allocation8 + $0xd20] sm:$0xff]  ;;  %v1003_v35 = vld [vmem:[#allocation8 + $0xd38] sm:$0xff]  ;;  %v2610_v59 = vpack.c.bf16 %v1034_v57, %v1031_v20  ;;  %v1054_v28 = vld [vmem:[#allocation8 + $0xed0] sm:$0xff] }
 0x1fc   :  { %1425 = vmatprep.mubr.f32.mxu1 %v2892_v15  ;;  %v1005_v15 = vld [vmem:[#allocation8 + $0xd48] sm:$0xff]  ;;  %v2592_v39 = vpack.c.bf16 %v1003_v35, %v1000_v5  ;;  %v1055_v24 = vld [vmem:[#allocation8 + $0xed8] sm:$0xff] }
 0x1fd   :  { %v2784_v19 = vpack.c.bf16 %v1005_v15, %v1002_v13  ;;  %v1046_v13 = vld [vmem:[#allocation8 + $0xe90] sm:$0xff]  ;;  %v2626_v27 = vpack.c.bf16 %v1058_v25, %v1055_v24  ;;  %v1809_v20 = vld [vmem:[#allocation11 + $0xc0] sm:$0xff]  ;;  %v1816_v24 = vld [vmem:[#allocation11 + $0xf8] sm:$0xff] }
 0x1fe   :  { %2573 = vmatpush1.bf16.msra.mxu1 %v2572_v41  ;;  %2773 = vmatpush3.bf16.msra.mxu0 %v2772_v43  ;;  %v1009_v41 = vld [vmem:[#allocation8 + $0xd68] sm:$0xff] }
 0x1ff   :  { %2575 = vmatprep.subr.bf16.mxu1 %v2574_v46  ;;  %2775 = vmatprep.subr.bf16.mxu0 %v2774_v37  ;;  %v1013_v43 = vld [vmem:[#allocation8 + $0xd88] sm:$0xff]  ;;  %v2596_v45 = vpack.c.bf16 %v1009_v41, %v1006_v40  ;;  %v1012_v37 = vld [vmem:[#allocation8 + $0xd80] sm:$0xff] }
 0x200   :  { %v2598_v46 = vpack.c.bf16 %v1016_v44, %v1013_v43  ;;  %v2600_v50 = vpack.c.bf16 %v1015_v47, %v1012_v37  ;;  %v1785_v40 = vld [vmem:[#allocation11] sm:$0xff]  ;;  %v1786_v43 = vld [vmem:[#allocation11 + $0x8] sm:$0xff]  ;;  %v1803_v44 = vld [vmem:[#allocation11 + $0x90] sm:$0xff] }
 0x201   :  { %v1787_v47 = vld [vmem:[#allocation11 + $0x10] sm:$0xff]  ;;  %v1810_v57 = vld [vmem:[#allocation11 + $0xc8] sm:$0xff] }
 0x202   :  { %2577 = vmatpush1.bf16.msra.mxu1 %v2576_v33  ;;  %2777 = vmatpush3.bf16.msra.mxu0 %v2776_v53  ;;  %v1025_v33 = vld [vmem:[#allocation8 + $0xde8] sm:$0xff]  ;;  %v1028_v53 = vld [vmem:[#allocation8 + $0xe00] sm:$0xff] }
 0x203   :  { %2579 = vmatprep.subr.bf16.mxu1 %v2578_v56  ;;  %2779 = vmatprep.subr.bf16.mxu0 %v2778_v58  ;;  %v2606_v55 = vpack.c.bf16 %v1028_v53, %v1025_v33  ;;  %v1024_v56 = vld [vmem:[#allocation8 + $0xde0] sm:$0xff]  ;;  %v1027_v58 = vld [vmem:[#allocation8 + $0xdf8] sm:$0xff] }
 0x204   :  { %v2608_v30 = vpack.c.bf16 %v1027_v58, %v1024_v56  ;;  %v1807_v33 = vld [vmem:[#allocation11 + $0xb0] sm:$0xff]  ;;  %v1808_v53 = vld [vmem:[#allocation11 + $0xb8] sm:$0xff] }
 0x205   :  { %v1791_v56 = vld [vmem:[#allocation11 + $0x30] sm:$0xff]  ;;  %v1792_v58 = vld [vmem:[#allocation11 + $0x38] sm:$0xff] }
 0x206   :  { %2581 = vmatpush1.bf16.msra.mxu1 %v2580_v63  ;;  %2781 = vmatpush3.bf16.msra.mxu0 %v2780_v3  ;;  %v1040_v63 = vld [vmem:[#allocation8 + $0xe60] sm:$0xff]  ;;  %v2612_v3 = vpack.c.bf16 %v1033_v60, %v1030_v62 }
 0x207   :  { %2583 = vmatprep.subr.bf16.mxu1 %v2582_v7  ;;  %2783 = vmatprep.subr.bf16.mxu0 %v2782_v8  ;;  %v2614_v4 = vpack.c.bf16 %v1040_v63, %v1037_v61  ;;  %v1039_v7 = vld [vmem:[#allocation8 + $0xe58] sm:$0xff]  ;;  %v1060_v62 = vld [vmem:[#allocation10] sm:$0x7] }
 0x208   :  { %v1043_v8 = vld [vmem:[#allocation8 + $0xe78] sm:$0xff]  ;;  %v2616_v15 = vpack.c.bf16 %v1039_v7, %v1036_v6  ;;  %v1073_v60 = vrot.slane %v1060_v62, %v171_v18  ;;  %v1793_v7 = vld [vmem:[#allocation11 + $0x40] sm:$0xff] }
 0x209   :  { %v2618_v16 = vpack.c.bf16 %v1046_v13, %v1043_v8  ;;  %v1794_v8 = vld [vmem:[#allocation11 + $0x48] sm:$0xff] }
 0x20a   :  { %2585 = vmatpush1.bf16.msra.mxu1 %v2584_v42  ;;  %2785 = vmatpush3.bf16.msra.mxu0 %v2784_v19  ;;  %v1052_v42 = vld [vmem:[#allocation8 + $0xec0] sm:$0xff]  ;;  %v2620_v19 = vpack.c.bf16 %v1045_v17, %v1042_v11  ;;  %v2808_v13 = vpack.c.bf16 %v1794_v8, %v1793_v7  ;;  %v1795_v17 = vld [vmem:[#allocation11 + $0x50] sm:$0xff] }
 0x20b   :  { %2587 = vmatprep.subr.bf16.mxu1 %v2586_v22  ;;  %2787 = vmatprep.subr.bf16.mxu0 %v2786_v23  ;;  %v2622_v21 = vpack.c.bf16 %v1052_v42, %v1049_v29  ;;  %v1048_v22 = vld [vmem:[#allocation8 + $0xea0] sm:$0xff]  ;;  %v1051_v23 = vld [vmem:[#allocation8 + $0xeb8] sm:$0xff] }
 0x20c   :  { %v2624_v26 = vpack.c.bf16 %v1051_v23, %v1048_v22  ;;  %v1796_v29 = vld [vmem:[#allocation11 + $0x58] sm:$0xff]  ;;  %v1798_v22 = vld [vmem:[#allocation11 + $0x68] sm:$0xff]  ;;  %v1815_v23 = vld [vmem:[#allocation11 + $0xf0] sm:$0xff] }
 0x20d   :  { %v2812_v42 = vpack.c.bf16 %v1796_v29, %v1795_v17  ;;  %v2816_v25 = vpack.c.bf16 %v1798_v22, %v1797_v9  ;;  %v1831_v8 = vld [vmem:[#allocation11 + $0x170] sm:$0xff] }
 0x20e   :  { %2589 = vmatpush1.bf16.msra.mxu1 %v2588_v31  ;;  %2789 = vmatpush3.bf16.msra.mxu0 %v2788_v32  ;;  %v1057_v31 = vld [vmem:[#allocation8 + $0xee8] sm:$0xff] }
 0x20f   :  { %2591 = vmatprep.subr.bf16.mxu1 %v2590_v34  ;;  %v2628_v32 = vpack.c.bf16 %v1057_v31, %v1054_v28  ;;  %v1800_v28 = vld [vmem:[#allocation11 + $0x78] sm:$0xff] }
 0x211   :  { %1777 = vmatmul.mubr.f32.vlgmr.msra.gmra.mrb[12].mxu0 %v3325_v14 }
 0x212   :  { %2593 = vmatpush1.bf16.msra.mxu1 %v2592_v39  ;;  %v1801_v39 = vld [vmem:[#allocation11 + $0x80] sm:$0xff] }
 0x213   :  { %2595 = vmatprep.subr.bf16.mxu1 %v2594_v1  ;;  %v1802_v1 = vld [vmem:[#allocation11 + $0x88] sm:$0xff] }
 0x214   :  { %v2790_v41 = vpack.c.bf16 %v1802_v1, %v1801_v39 }
 0x216   :  { %2597 = vmatpush1.bf16.msra.mxu1 %v2596_v45  ;;  %v1804_v45 = vld [vmem:[#allocation11 + $0x98] sm:$0xff]  ;;  %2791 = vmatprep.subr.bf16.mxu0 %v2790_v41 }
 0x217   :  { %2599 = vmatprep.subr.bf16.mxu1 %v2598_v46  ;;  %v2792_v46 = vpack.c.bf16 %v1786_v43, %v1785_v40  ;;  %v2794_v37 = vpack.c.bf16 %v1804_v45, %v1803_v44 }
 0x219   :  { %2793 = vmatpush3.bf16.msra.mxu0 %v2792_v46 }
 0x21a   :  { %2601 = vmatpush1.bf16.msra.mxu1 %v2600_v50  ;;  %v2796_v50 = vpack.c.bf16 %v1788_v48, %v1787_v47  ;;  %2795 = vmatprep.subr.bf16.mxu0 %v2794_v37  ;;  %v1065_v47 = vrot.slane %v1060_v62, %v3255_v10  ;;  %v1069_v48 = vrot.slane %v1060_v62, %v3260_v12  ;;  %v1821_v12 = vld [vmem:[#allocation11 + $0x120] sm:$0xff] }
 0x21b   :  { %2603 = vmatprep.subr.bf16.mxu1 %v2602_v51  ;;  %v1825_v62 = vld [vmem:[#allocation11 + $0x140] sm:$0xff] }
 0x21d   :  { %2797 = vmatpush3.bf16.msra.mxu0 %v2796_v50 }
 0x21e   :  { %2605 = vmatpush1.bf16.msra.mxu1 %v2604_v54  ;;  %v2800_v54 = vpack.c.bf16 %v1790_v2, %v1789_v52 }
 0x21f   :  { %2607 = vmatprep.subr.bf16.mxu1 %v2606_v55  ;;  %v2802_v55 = vpack.c.bf16 %v1808_v53, %v1807_v33  ;;  %v1817_v33 = vld [vmem:[#allocation11 + $0x100] sm:$0xff]  ;;  %v1818_v53 = vld [vmem:[#allocation11 + $0x108] sm:$0xff] }
 0x222   :  { %2609 = vmatpush1.bf16.msra.mxu1 %v2608_v30  ;;  %v2804_v30 = vpack.c.bf16 %v1792_v58, %v1791_v56  ;;  %v1819_v56 = vld [vmem:[#allocation11 + $0x110] sm:$0xff]  ;;  %v1820_v58 = vld [vmem:[#allocation11 + $0x118] sm:$0xff] }
 0x223   :  { %2611 = vmatprep.subr.bf16.mxu1 %v2610_v59  ;;  %v2806_v59 = vpack.c.bf16 %v1810_v57, %v1809_v20  ;;  %v2826_v10 = vpack.c.bf16 %v1820_v58, %v1819_v56  ;;  %v1823_v57 = vld [vmem:[#allocation11 + $0x130] sm:$0xff] }
 0x226   :  { %2613 = vmatpush1.bf16.msra.mxu1 %v2612_v3 }
 0x227   :  { %2615 = vmatprep.subr.bf16.mxu1 %v2614_v4 }
 0x22a   :  { %2617 = vmatpush1.bf16.msra.mxu1 %v2616_v15  ;;  %v1811_v15 = vld [vmem:[#allocation11 + $0xd0] sm:$0xff] }
 0x22b   :  { %2619 = vmatprep.subr.bf16.mxu1 %v2618_v16  ;;  %v1812_v16 = vld [vmem:[#allocation11 + $0xd8] sm:$0xff] }
 0x22c   :  { %v2810_v11 = vpack.c.bf16 %v1812_v16, %v1811_v15 }
 0x22e   :  { %2621 = vmatpush1.bf16.msra.mxu1 %v2620_v19  ;;  %v1813_v19 = vld [vmem:[#allocation11 + $0xe0] sm:$0xff] }
 0x22f   :  { %2623 = vmatprep.subr.bf16.mxu1 %v2622_v21  ;;  %v1814_v21 = vld [vmem:[#allocation11 + $0xe8] sm:$0xff] }
 0x230   :  { %v2814_v18 = vpack.c.bf16 %v1814_v21, %v1813_v19 }
 0x232   :  { %2625 = vmatpush1.bf16.msra.mxu1 %v2624_v26  ;;  %v2818_v26 = vpack.c.bf16 %v1816_v24, %v1815_v23 }
 0x233   :  { %2627 = vmatprep.subr.bf16.mxu1 %v2626_v27  ;;  %v1799_v27 = vld [vmem:[#allocation11 + $0x70] sm:$0xff] }
 0x234   :  { %v2820_v31 = vpack.c.bf16 %v1800_v28, %v1799_v27 }
 0x236   :  { %2629 = vmatpush1.bf16.msra.mxu1 %v2628_v32  ;;  %v3105_v32 = vmov 0.0|0.0  }
 0x239   :  { %1426 = vmatmul.mubr.f32.vlgmr.msra.gmra.mrb[8].mxu1 %v3325_v14  ;;  %v1806_v14 = vld [vmem:[#allocation11 + $0xa8] sm:$0xff] }
 0x23a   :  { %v2798_v51 = vpack.c.bf16 %v1806_v14, %v1805_v49 }
 0x23c   :  { %2799 = vmatprep.subr.bf16.mxu0 %v2798_v51 }
 0x23d   :  { %2801 = vmatpush3.bf16.msra.mxu0 %v2800_v54  ;;  %v2823_v54 = vpack.c.bf16 %v1818_v53, %v1817_v33 }
 0x23e   :  { %2803 = vmatprep.subr.bf16.mxu0 %v2802_v55 }
 0x241   :  { %2805 = vmatpush3.bf16.msra.mxu0 %v2804_v30  ;;  %v1824_v30 = vld [vmem:[#allocation11 + $0x138] sm:$0xff] }
 0x242   :  { %2807 = vmatprep.subr.bf16.mxu0 %v2806_v59  ;;  %v2832_v59 = vpack.c.bf16 %v1824_v30, %v1823_v57 }
 0x244   :  { %v3329_v34 = vpop.f32.mrb[2].mxu0 }
 0x245   :  { %v3331_v5 = vpop.f32.mrb[3].mxu0  ;;  %2809 = vmatpush3.bf16.msra.mxu0 %v2808_v13  ;;  %v1144_v49 = vadd.f32 %v3329_v34, %v1065_v47  ;;  %v1822_v34 = vld [vmem:[#allocation11 + $0x128] sm:$0xff]  ;;  %v1832_v13 = vld [vmem:[#allocation11 + $0x178] sm:$0xff] }
 0x246   :  { %2811 = vmatprep.subr.bf16.mxu0 %v2810_v11  ;;  %v1146_v14 = vadd.f32 %v3331_v5, %v1069_v48  ;;  %v2829_v5 = vpack.c.bf16 %v1822_v34, %v1821_v12  ;;  %v2844_v15 = vpack.c.bf16 %v1832_v13, %v1831_v8 }
 0x249   :  { %2813 = vmatpush3.bf16.msra.mxu0 %v2812_v42  ;;  %v2007_v42 = vld [vmem:[#allocation13] ss:$0 sm:$0xff] }
 0x24a   :  { %2815 = vmatprep.subr.bf16.mxu0 %v2814_v18 }
 0x24d   :  { %2817 = vmatpush3.bf16.msra.mxu0 %v2816_v25 }
 0x24e   :  { %2819 = vmatprep.subr.bf16.mxu0 %v2818_v26 }
 0x251   :  { %2821 = vmatpush3.bf16.msra.mxu0 %v2820_v31 }
 0x252   :  { %2822 = vmatprep.subr.bf16.mxu0 %v3105_v32 }
 0x264   :  { %v2040_v35 = vpop.f32.mrb[4].mxu0 }
 0x265   :  { %v2041_v36 = vpop.f32.mrb[5].mxu0 }
 0x266   :  { %v2042_v38 = vadd.f32 %v2041_v36, %v2040_v35 }
 0x268   :  { %v1499_v3 = vadd.f32 %v2042_v38, %v1073_v60  ;;  %v1826_v60 = vld [vmem:[#allocation11 + $0x148] sm:$0xff] }
 0x284   :  { %v2075_v61 = vpop.f32.mrb[6].mxu0 }
 0x285   :  { %v2076_v63 = vpop.f32.mrb[7].mxu0 }
 0x286   :  { %v2077_v4 = vadd.f32 %v2076_v63, %v2075_v61  ;;  %v2835_v61 = vpack.c.bf16 %v1826_v60, %v1825_v62  ;;  %v1828_v63 = vld [vmem:[#allocation11 + $0x158] sm:$0xff] }
 0x288   :  { %v1569_v6 = vadd.f32 %v2077_v4, %v1499_v3  ;;  %v1829_v4 = vld [vmem:[#allocation11 + $0x160] sm:$0xff] }
 0x2a4   :  { %v2110_v35 = vpop.f32.mrb[8].mxu0 }
 0x2a5   :  { %v2111_v36 = vpop.f32.mrb[9].mxu0 }
 0x2a6   :  { %v2112_v38 = vadd.f32 %v2111_v36, %v2110_v35 }
 0x2a8   :  { %v1639_v39 = vadd.f32 %v2112_v38, %v1569_v6  ;;  %v1830_v6 = vld [vmem:[#allocation11 + $0x168] sm:$0xff] }
 0x2a9   :  { %v2841_v7 = vpack.c.bf16 %v1830_v6, %v1829_v4 }
 0x2c4   :  { %v2145_v1 = vpop.f32.mrb[10].mxu0 }
 0x2c5   :  { %v2146_v40 = vpop.f32.mrb[11].mxu0 }
 0x2c6   :  { %v2147_v41 = vadd.f32 %v2146_v40, %v2145_v1 }
 0x2c8   :  { %v1709_v43 = vadd.f32 %v2147_v41, %v1639_v39 }
 0x2e4   :  { %v2180_v44 = vpop.f32.mrb[12].mxu0 }
 0x2e5   :  { %v2181_v45 = vpop.f32.mrb[13].mxu0 }
 0x2e6   :  { %v2182_v46 = vadd.f32 %v2181_v45, %v2180_v44 }
 0x2e8   :  { %v1779_v37 = vadd.f32 %v2182_v46, %v1709_v43 }
 0x30c   :  { %v1427_v50 = vpop.f32.mrb[8].mxu1 }
 0x30d   :  { %v2847_v51 = vadd.f32 %v1427_v50, %v1144_v49  ;;  %v1429_v52 = vpop.f32.mrb[9].mxu1 }
 0x30e   :  { %v2849_v2 = vadd.f32 %v1429_v52, %v1146_v14 }
 0x310   :  { %2895 = vtanh.f32 %v2849_v2 }
 0x311   :  { %2897 = vtanh.f32 %v2847_v51 }
 0x312   :  { %2899 = vtanh.f32 %v1779_v37 }
 0x31a   :  { %v2896_v55 = vpop.eup %2895 }
 0x31b   :  { %v2898_v20 = vpop.eup %2897  ;;  %1904 = vmatprep.mubr.f32.mxu0 %v2896_v55 }
 0x31c   :  { %1905 = vmatmul.mubr.f32.vlgmr.msra.gmra.mrb[14].mxu0 %v2898_v20  ;;  %v2900_v16 = vpop.eup %2899 }
 0x31d   :  { %2824 = vmatpush3.bf16.msra.mxu0 %v2823_v54  ;;  %2267 = vmatprep.mubr.msk.f32.mxu0 %vm3106_vm1, %v3104_v0  ;;  %v1827_v0 = vld [vmem:[#allocation11 + $0x150] sm:$0xff] }
 0x31e   :  { %2825 = vmatprep.subr.bf16.mxu0 %v3105_v32  ;;  %v2838_v3 = vpack.c.bf16 %v1828_v63, %v1827_v0 }
 0x321   :  { %2827 = vmatpush3.bf16.msra.mxu0 %v2826_v10 }
 0x322   :  { %2828 = vmatprep.subr.bf16.mxu0 %v3105_v32 }
 0x325   :  { %2830 = vmatpush3.bf16.msra.mxu0 %v2829_v5 }
 0x326   :  { %2831 = vmatprep.subr.bf16.mxu0 %v3105_v32 }
 0x329   :  { %2833 = vmatpush3.bf16.msra.mxu0 %v2832_v59 }
 0x32a   :  { %2834 = vmatprep.subr.bf16.mxu0 %v3105_v32 }
 0x32d   :  { %2836 = vmatpush3.bf16.msra.mxu0 %v2835_v61 }
 0x32e   :  { %2837 = vmatprep.subr.bf16.mxu0 %v3105_v32 }
 0x331   :  { %2839 = vmatpush3.bf16.msra.mxu0 %v2838_v3 }
 0x332   :  { %2840 = vmatprep.subr.bf16.mxu0 %v3105_v32 }
 0x335   :  { %2842 = vmatpush3.bf16.msra.mxu0 %v2841_v7 }
 0x336   :  { %2843 = vmatprep.subr.bf16.mxu0 %v3105_v32 }
 0x339   :  { %2845 = vmatpush3.bf16.msra.mxu0 %v2844_v15 }
 0x33c   :  { %2268 = vmatmul.mubr.f32.vlgmr.msra.gmra.mrb[16].mxu0 %v2900_v16 }
 0x3ef   :  { %v2215_v11 = vpop.f32.mrb[14].mxu0 }
 0x3f0   :  { %v2216_v17 = vpop.f32.mrb[15].mxu0 }
 0x3f1   :  { %v2217_v29 = vadd.f32 %v2216_v17, %v2215_v11 }
 0x3f3   :  { %v1907_v19 = vadd.f32 %v2217_v29, %v2007_v42 }
 0x40f   :  { %v1976_v21 = vpop.f32.mrb[16].mxu0 }
 0x410   :  { %v1977_v9 = vadd.f32 %v1976_v21, %v1907_v19  ;;  %v2269_v18 = vpop.f32.mrb[17].mxu0 }
 0x412   :  { %2901 = vtanh.f32 %v1977_v9 }
 0x41c   :  { %v2902_v22 = vpop.eup %2901 }
 0x41d   :  { %1981 = vst [vmem:[#allocation14] sm:$0xff] %v2902_v22 }
 0x41e   :  { %1986 = vsyncadd [#allocation4], 96  ;;  %s3107_s6 = smov [#allocation14]  }
 0x41f   :  { %s1987_s0 = sshll.u32 %s3107_s6, 4  ;;  %s1988_s0 = int_to_ptr.vmem [resolvable:$true] %s1987_s0 }
 0x420   :  { %s3057_s18 = scalar_lea.vmem %s1988_s0, 32  ;;  %s3061_s19 = scalar_lea.vmem %s1988_s0, 128 }
 0x421   :  { %p3058_p0 = scmp.ne.s32.totalorder %s1988_s0, %s3057_s18  ;;  %p3062_p1 = scmp.lt.s32.totalorder %s1988_s0, %s1988_s0 }
 0x422   :  { %p3063_p2 = scmp.lt.s32.totalorder %s3061_s19, %s3057_s18 }
 0x424   :  { %p3064_p3 = por %p3063_p2, %p3062_p1 }
 0x426   :  { %p3065_p4 = pnand %p3064_p3, %p3058_p0 }
 0x428   :  { %3068 = shalt.err (!%p3065_p4)
}
 0x429   :  { %s3069_s22 = scalar_lea.hbm %s3370_s7, 32 }
 0x42a   :  { %p3070_p5 = scmp.ne.s32.totalorder %s3370_s7, %s3069_s22  ;;  %p3073_p6 = scmp.lt.u32.totalorder %s3069_s22, %s3370_s7 }
 0x42c   :  { %p3075_p7 = pnand %p3073_p6, %p3070_p5 }
 0x42e   :  { %3078 = shalt.err (!%p3075_p7)
}
 0x42f   :  { %1993 = dma.vmem_to_hbm [thread:$0]  %s1988_s0, 32, %s3370_s7, [#allocation4], %s3099_s27, %s3099_s27, %s3100_s28  }
 0x430   :  { %3087 = dma.done.wait [#allocation4], 128  }
 0x431   :  { %3088 = vsyncadd [#allocation4], 4294967168 }
 0x432   :  { %1997 = vsyncpa [#allocation3], 1 }
 0x433   :  { %1998 = vsyncpa [#allocation6], 1 }
 0x434   :  { %1999 = vsyncpa [#allocation9], 1 }
 0x435   :  { %2000 = vsyncpa [#allocation12], 1 }
 0x436   :  { %2001 = vsyncpa [#allocation4], 1 }

</bundles_post_ra>
